<compile_context>
chip_gen: v7x
topology: tpu7x:2x2x1
jax: 0.10.0
libtpu: 0.0.40
codegen_flags: <defaults>
</compile_context>

<pallas_src>
import functools

import jax
import jax.numpy as jnp
from jax import lax
from jax.experimental import pallas as pl
from jax.experimental.pallas import tpu as pltpu


def _dqn_forward_impl(x_nchw, params):
    w1, b1, w2, b2, w3, b3 = params
    f32 = jnp.float32

    N, Cin, H, W = x_nchw.shape
    KH, KW, _, C1 = w1.shape
    C2 = w2.shape[-1]
    A = w3.shape[-1]
    H1, W1 = H - KH + 1, W - KW + 1          # conv1 output spatial dims
    H2, W2 = H1 - KH + 1, W1 - KW + 1        # conv2 output spatial dims
    assert W2 == w3.shape[0], "Linear in_features must equal conv2 output width"
    assert W2 % 8 == 0, "conv2 slice alignment relies on W2 % 8 == 0"

    KWE = 2 * KW - 1                         # kw-expanded conv1 window width
    K1E = KH * KWE * Cin                     # expanded conv1 contraction dim (112)
    KWC1 = KW * C1                           # conv2 per-kh contraction dim (128)
    M1 = H1 * W2                             # conv1 rows per image (448)
    M2 = H2 * W2                             # conv2 rows per image (256)
    MO = H2 * A                              # output rows per image (24)

    x_nhwc = jnp.transpose(x_nchw, (0, 2, 3, 1)).astype(f32)

    # ---- kw-expanded conv1 im2col (pure data movement, fused under jit).
    # P[n, (h1, w1), (i, jj, cin)] = x[n, h1+i, w1+jj, cin]
    cols = [x_nhwc[:, i:i + H1, jj:jj + W2, :]
            for i in range(KH) for jj in range(KWE)]
    p1 = jnp.concatenate(cols, axis=-1).reshape(N * M1, K1E)

    # ---- conv1 weight in kw-expanded block form (constant-folded under jit):
    # Wbig[(i, jj, cin), kw*C1 + c1] = w1[i, jj-kw, cin, c1] if 0 <= jj-kw < KW else 0
    wbig = jnp.zeros((KH, KWE, Cin, KW, C1), f32)
    for kw in range(KW):
        wbig = wbig.at[:, kw:kw + KW, :, kw, :].set(w1.astype(f32))
    wbig = wbig.reshape(K1E, KWC1)
    b1big = jnp.tile(b1.astype(f32), KW).reshape(1, KWC1)

    w2f = w2.reshape(KH * KW * C1, C2).astype(f32)    # rows ordered (kh, kw, c1)
    b2r = b2.reshape(1, C2).astype(f32)

    # ---- per-image block-diagonal linear weight: fixed (H2*A, H2*W2), no N^2 term.
    w3bd = jnp.kron(jnp.eye(H2, dtype=f32), jnp.transpose(w3).astype(f32))
    b3bd = jnp.tile(b3.astype(f32), H2).reshape(MO, 1)

    def kernel(p_ref, w1_ref, b1_ref, w2_ref, b2_ref, w3_ref, b3_ref,
               out_ref, z_ref):
        # conv1: ONE MXU matmul; output already holds the kw-concatenated
        # activation conv2 needs; lane-dense (128-wide) store into scratch.
        z = jnp.dot(p_ref[...], w1_ref[...], preferred_element_type=jnp.float32)
        z_ref[...] = jnp.maximum(z + b1_ref[...], 0.0)

        # conv2: KH accumulating matmuls, one per kh.  Each LHS is a contiguous
        # sublane-aligned row slice of z (start kh*W2), K = KW*C1 = 128.
        acc = jnp.dot(z_ref[0:M2, :], w2_ref[0:KWC1, :],
                      preferred_element_type=jnp.float32)
        for kh in range(1, KH):
            acc = acc + jnp.dot(z_ref[kh * W2:kh * W2 + M2, :],
                                w2_ref[kh * KWC1:(kh + 1) * KWC1, :],
                                preferred_element_type=jnp.float32)
        a2 = jnp.maximum(acc + b2_ref[...], 0.0)

        # Linear over the conv2 width axis, all H2 rows of this image fused in
        # one matmul via the per-image block-diagonal weight.
        y = jnp.dot(w3_ref[...], a2, preferred_element_type=jnp.float32)
        out_ref[0] = (y + b3_ref[...]).astype(out_ref.dtype)

    out_flat = pl.pallas_call(
        kernel,
        out_shape=jax.ShapeDtypeStruct((N, MO, C2), f32),
        grid_spec=pltpu.PrefetchScalarGridSpec(
            num_scalar_prefetch=0,
            grid=(N,),
            in_specs=[
                pl.BlockSpec((M1, K1E), lambda n: (n, 0)),        # per-image patches
                pl.BlockSpec((K1E, KWC1), lambda n: (0, 0)),      # conv1 weight (expanded)
                pl.BlockSpec((1, KWC1), lambda n: (0, 0)),        # conv1 bias (tiled)
                pl.BlockSpec((KH * KWC1, C2), lambda n: (0, 0)),  # conv2 weight
                pl.BlockSpec((1, C2), lambda n: (0, 0)),          # conv2 bias
                pl.BlockSpec((MO, M2), lambda n: (0, 0)),         # linear weight (per-image block-diag)
                pl.BlockSpec((MO, 1), lambda n: (0, 0)),          # linear bias
            ],
            out_specs=pl.BlockSpec((1, MO, C2), lambda n: (n, 0, 0)),
            scratch_shapes=[pltpu.VMEM((M1, KWC1), f32)],         # conv1 activation
        ),
        compiler_params=pltpu.CompilerParams(
            dimension_semantics=("parallel",)),
    )(p1, wbig, b1big, w2f, b2r, w3bd, b3bd)

    # (N, H2*A, C2) -> (N, H2, A, C2) -> PyTorch layout (N, C2, H2, A).
    return jnp.transpose(out_flat.reshape(N, H2, A, C2), (0, 3, 1, 2))


def make_dqn_forward(params):
    """Jitted forward(x); params are closed over so weight repacking (incl. the
    kron) is constant-folded once at compile time."""
    return jax.jit(functools.partial(_dqn_forward_impl, params=params))


def ref_forward(x_nchw, params):
    """Pure-JAX reference replicating the PyTorch forward exactly."""
    w1, b1, w2, b2, w3, b3 = params
    dn = ("NHWC", "HWIO", "NHWC")
    hi = lax.Precision.HIGHEST
    x = jnp.transpose(x_nchw, (0, 2, 3, 1))
    y = lax.conv_general_dilated(x, w1, (1, 1), "VALID",
                                 dimension_numbers=dn, precision=hi) + b1
    y = jnp.maximum(y, 0.0)
    y = lax.conv_general_dilated(y, w2, (1, 1), "VALID",
                                 dimension_numbers=dn, precision=hi) + b2
    y = jnp.maximum(y, 0.0)
    y = jnp.transpose(y, (0, 3, 1, 2))                 # NCHW: (N, 64, H2, W2)
    return jnp.dot(y, w3, precision=hi) + b3           # Linear on last dim


if __name__ == "__main__":
    # W = 70 is forced by the module: Linear(64, actions) is applied to the
    # NCHW conv2 output, whose last dim is W - 6, so W - 6 must equal 64.
    N, Cin, H, W = 2, 4, 10, 70
    A = 6  # actions

    key = jax.random.PRNGKey(0)
    ks = jax.random.split(key, 7)
    w1 = jax.random.normal(ks[0], (4, 4, Cin, 32), jnp.float32) * 0.10
    b1 = jax.random.normal(ks[1], (32,), jnp.float32) * 0.10
    w2 = jax.random.normal(ks[2], (4, 4, 32, 64), jnp.float32) * 0.05
    b2 = jax.random.normal(ks[3], (64,), jnp.float32) * 0.05
    w3 = jax.random.normal(ks[4], (64, A), jnp.float32) * 0.10
    b3 = jax.random.normal(ks[5], (A,), jnp.float32) * 0.10
    x = jax.random.normal(ks[6], (N, Cin, H, W), jnp.float32)

    params = (w1, b1, w2, b2, w3, b3)

    forward = make_dqn_forward(params)
    out = jax.block_until_ready(forward(x))
    ref = jax.block_until_ready(ref_forward(x, params))

    assert out.shape == (N, 64, H - 6, A), out.shape
    max_err = float(jnp.max(jnp.abs(out - ref)))
    if max_err > 5e-3:
        raise SystemExit(f"mismatch vs reference: max abs err = {max_err}")

    print("KERNEL_OK")
</pallas_src>

<mosaic_0001>
module attributes {stable_mosaic.version = 11 : i64} {
  func.func @kernel(%arg0: i32, %arg1: memref<448x112xf32, #tpu.memory_space<vmem>>, %arg2: memref<112x128xf32, #tpu.memory_space<vmem>>, %arg3: memref<1x128xf32, #tpu.memory_space<vmem>>, %arg4: memref<512x64xf32, #tpu.memory_space<vmem>>, %arg5: memref<1x64xf32, #tpu.memory_space<vmem>>, %arg6: memref<24x256xf32, #tpu.memory_space<vmem>>, %arg7: memref<24x1xf32, #tpu.memory_space<vmem>>, %arg8: memref<1x24x64xf32, #tpu.memory_space<vmem>>, %arg9: memref<448x128xf32, #tpu.memory_space<vmem>>) attributes {dimension_semantics = [#tpu.dimension_semantics<parallel>], iteration_bounds = array<i64: 2>, scalar_prefetch = 0 : i64, scratch_operands = 1 : i64, tpu.core_type = #tpu.core_type<tc>, window_params = [{transform_indices = @transform_0, window_bounds = array<i64: 448, 112>}, {pipeline_mode = #tpu.pipeline_mode<synchronous>, transform_indices = @transform_1, window_bounds = array<i64: 112, 128>}, {pipeline_mode = #tpu.pipeline_mode<synchronous>, transform_indices = @transform_2, window_bounds = array<i64: 1, 128>}, {pipeline_mode = #tpu.pipeline_mode<synchronous>, transform_indices = @transform_3, window_bounds = array<i64: 512, 64>}, {pipeline_mode = #tpu.pipeline_mode<synchronous>, transform_indices = @transform_4, window_bounds = array<i64: 1, 64>}, {pipeline_mode = #tpu.pipeline_mode<synchronous>, transform_indices = @transform_5, window_bounds = array<i64: 24, 256>}, {pipeline_mode = #tpu.pipeline_mode<synchronous>, transform_indices = @transform_6, window_bounds = array<i64: 24, 1>}, {transform_indices = @transform_7, window_bounds = array<i64: 1, 24, 64>}]} {
    %c0 = arith.constant 0 : index
    %c0_0 = arith.constant 0 : index
    %0 = vector.load %arg1[%c0, %c0_0] : memref<448x112xf32, #tpu.memory_space<vmem>>, vector<448x112xf32>
    %c0_1 = arith.constant 0 : index
    %c0_2 = arith.constant 0 : index
    %1 = vector.load %arg2[%c0_1, %c0_2] : memref<112x128xf32, #tpu.memory_space<vmem>>, vector<112x128xf32>
    %cst = arith.constant dense<0.000000e+00> : vector<448x128xf32>
    %2 = tpu.matmul %0, %1, %cst {dimension_numbers = #tpu.dot_dimension_numbers<[1], [0], [0], [1], [0, 0, 1, 1], [], []>} : vector<448x112xf32>, vector<112x128xf32>, vector<448x128xf32> -> vector<448x128xf32>
    %c0_3 = arith.constant 0 : index
    %c0_4 = arith.constant 0 : index
    %3 = vector.load %arg3[%c0_3, %c0_4] : memref<1x128xf32, #tpu.memory_space<vmem>>, vector<1x128xf32>
    %4 = vector.broadcast %3 : vector<1x128xf32> to vector<448x128xf32>
    %5 = arith.addf %2, %4 : vector<448x128xf32>
    %cst_5 = arith.constant 0.000000e+00 : f32
    %6 = vector.broadcast %cst_5 : f32 to vector<448x128xf32>
    %7 = arith.maximumf %5, %6 : vector<448x128xf32>
    %c0_6 = arith.constant 0 : index
    %c0_7 = arith.constant 0 : index
    %8 = vector.load %arg9[%c0_6, %c0_7] : memref<448x128xf32, #tpu.memory_space<vmem>>, vector<448x128xf32>
    tpu.vector_store %arg9[%c0_6, %c0_7], %7 {strides = array<i32>} : memref<448x128xf32, #tpu.memory_space<vmem>>, vector<448x128xf32>,
    %c0_8 = arith.constant 0 : index
    %c0_9 = arith.constant 0 : index
    %9 = vector.load %arg9[%c0_8, %c0_9] : memref<448x128xf32, #tpu.memory_space<vmem>>, vector<256x128xf32>
    %c0_10 = arith.constant 0 : index
    %c0_11 = arith.constant 0 : index
    %10 = vector.load %arg4[%c0_10, %c0_11] : memref<512x64xf32, #tpu.memory_space<vmem>>, vector<128x64xf32>
    %cst_12 = arith.constant dense<0.000000e+00> : vector<256x64xf32>
    %11 = tpu.matmul %9, %10, %cst_12 {dimension_numbers = #tpu.dot_dimension_numbers<[1], [0], [0], [1], [0, 0, 1, 1], [], []>} : vector<256x128xf32>, vector<128x64xf32>, vector<256x64xf32> -> vector<256x64xf32>
    %c64 = arith.constant 64 : index
    %c0_13 = arith.constant 0 : index
    %12 = vector.load %arg9[%c64, %c0_13] : memref<448x128xf32, #tpu.memory_space<vmem>>, vector<256x128xf32>
    %c128 = arith.constant 128 : index
    %c0_14 = arith.constant 0 : index
    %13 = vector.load %arg4[%c128, %c0_14] : memref<512x64xf32, #tpu.memory_space<vmem>>, vector<128x64xf32>
    %cst_15 = arith.constant dense<0.000000e+00> : vector<256x64xf32>
    %14 = tpu.matmul %12, %13, %cst_15 {dimension_numbers = #tpu.dot_dimension_numbers<[1], [0], [0], [1], [0, 0, 1, 1], [], []>} : vector<256x128xf32>, vector<128x64xf32>, vector<256x64xf32> -> vector<256x64xf32>
    %15 = arith.addf %11, %14 : vector<256x64xf32>
    %c128_16 = arith.constant 128 : index
    %c0_17 = arith.constant 0 : index
    %16 = vector.load %arg9[%c128_16, %c0_17] : memref<448x128xf32, #tpu.memory_space<vmem>>, vector<256x128xf32>
    %c256 = arith.constant 256 : index
    %c0_18 = arith.constant 0 : index
    %17 = vector.load %arg4[%c256, %c0_18] : memref<512x64xf32, #tpu.memory_space<vmem>>, vector<128x64xf32>
    %cst_19 = arith.constant dense<0.000000e+00> : vector<256x64xf32>
    %18 = tpu.matmul %16, %17, %cst_19 {dimension_numbers = #tpu.dot_dimension_numbers<[1], [0], [0], [1], [0, 0, 1, 1], [], []>} : vector<256x128xf32>, vector<128x64xf32>, vector<256x64xf32> -> vector<256x64xf32>
    %19 = arith.addf %15, %18 : vector<256x64xf32>
    %c192 = arith.constant 192 : index
    %c0_20 = arith.constant 0 : index
    %20 = vector.load %arg9[%c192, %c0_20] : memref<448x128xf32, #tpu.memory_space<vmem>>, vector<256x128xf32>
    %c384 = arith.constant 384 : index
    %c0_21 = arith.constant 0 : index
    %21 = vector.load %arg4[%c384, %c0_21] : memref<512x64xf32, #tpu.memory_space<vmem>>, vector<128x64xf32>
    %cst_22 = arith.constant dense<0.000000e+00> : vector<256x64xf32>
    %22 = tpu.matmul %20, %21, %cst_22 {dimension_numbers = #tpu.dot_dimension_numbers<[1], [0], [0], [1], [0, 0, 1, 1], [], []>} : vector<256x128xf32>, vector<128x64xf32>, vector<256x64xf32> -> vector<256x64xf32>
    %23 = arith.addf %19, %22 : vector<256x64xf32>
    %c0_23 = arith.constant 0 : index
    %c0_24 = arith.constant 0 : index
    %24 = vector.load %arg5[%c0_23, %c0_24] : memref<1x64xf32, #tpu.memory_space<vmem>>, vector<1x64xf32>
    %25 = vector.broadcast %24 : vector<1x64xf32> to vector<256x64xf32>
    %26 = arith.addf %23, %25 : vector<256x64xf32>
    %cst_25 = arith.constant 0.000000e+00 : f32
    %27 = vector.broadcast %cst_25 : f32 to vector<256x64xf32>
    %28 = arith.maximumf %26, %27 : vector<256x64xf32>
    %c0_26 = arith.constant 0 : index
    %c0_27 = arith.constant 0 : index
    %29 = vector.load %arg6[%c0_26, %c0_27] : memref<24x256xf32, #tpu.memory_space<vmem>>, vector<24x256xf32>
    %cst_28 = arith.constant dense<0.000000e+00> : vector<24x64xf32>
    %30 = tpu.matmul %29, %28, %cst_28 {dimension_numbers = #tpu.dot_dimension_numbers<[1], [0], [0], [1], [0, 0, 1, 1], [], []>} : vector<24x256xf32>, vector<256x64xf32>, vector<24x64xf32> -> vector<24x64xf32>
    %c0_29 = arith.constant 0 : index
    %c0_30 = arith.constant 0 : index
    %31 = vector.load %arg7[%c0_29, %c0_30] : memref<24x1xf32, #tpu.memory_space<vmem>>, vector<24x1xf32>
    %32 = vector.broadcast %31 : vector<24x1xf32> to vector<24x64xf32>
    %33 = arith.addf %30, %32 : vector<24x64xf32>
    %c0_31 = arith.constant 0 : index
    %c0_32 = arith.constant 0 : index
    %c0_33 = arith.constant 0 : index
    %34 = vector.load %arg8[%c0_31, %c0_32, %c0_33] : memref<1x24x64xf32, #tpu.memory_space<vmem>>, vector<1x24x64xf32>
    %35 = vector.shape_cast %34 : vector<1x24x64xf32> to vector<24x64xf32>
    %36 = vector.shape_cast %33 : vector<24x64xf32> to vector<1x24x64xf32>
    tpu.vector_store %arg8[%c0_31, %c0_32, %c0_33], %36 {strides = array<i32>} : memref<1x24x64xf32, #tpu.memory_space<vmem>>, vector<1x24x64xf32>,
    return
  }
  func.func @transform_0(%arg0: i32) -> (i32, i32) {
    %c0_i32 = arith.constant 0 : i32
    %c0_i32_0 = arith.constant 0 : i32
    return %arg0, %c0_i32 : i32, i32
  }
  func.func @transform_1(%arg0: i32) -> (i32, i32) {
    %c0_i32 = arith.constant 0 : i32
    %c0_i32_0 = arith.constant 0 : i32
    %c0_i32_1 = arith.constant 0 : i32
    return %c0_i32, %c0_i32_0 : i32, i32
  }
  func.func @transform_2(%arg0: i32) -> (i32, i32) {
    %c0_i32 = arith.constant 0 : i32
    %c0_i32_0 = arith.constant 0 : i32
    %c0_i32_1 = arith.constant 0 : i32
    return %c0_i32, %c0_i32_0 : i32, i32
  }
  func.func @transform_3(%arg0: i32) -> (i32, i32) {
    %c0_i32 = arith.constant 0 : i32
    %c0_i32_0 = arith.constant 0 : i32
    %c0_i32_1 = arith.constant 0 : i32
    return %c0_i32, %c0_i32_0 : i32, i32
  }
  func.func @transform_4(%arg0: i32) -> (i32, i32) {
    %c0_i32 = arith.constant 0 : i32
    %c0_i32_0 = arith.constant 0 : i32
    %c0_i32_1 = arith.constant 0 : i32
    return %c0_i32, %c0_i32_0 : i32, i32
  }
  func.func @transform_5(%arg0: i32) -> (i32, i32) {
    %c0_i32 = arith.constant 0 : i32
    %c0_i32_0 = arith.constant 0 : i32
    %c0_i32_1 = arith.constant 0 : i32
    return %c0_i32, %c0_i32_0 : i32, i32
  }
  func.func @transform_6(%arg0: i32) -> (i32, i32) {
    %c0_i32 = arith.constant 0 : i32
    %c0_i32_0 = arith.constant 0 : i32
    %c0_i32_1 = arith.constant 0 : i32
    return %c0_i32, %c0_i32_0 : i32, i32
  }
  func.func @transform_7(%arg0: i32) -> (i32, i32, i32) {
    %c0_i32 = arith.constant 0 : i32
    %c0_i32_0 = arith.constant 0 : i32
    %c0_i32_1 = arith.constant 0 : i32
    return %arg0, %c0_i32, %c0_i32_0 : i32, i32, i32
  }
}

</mosaic_0001>

<bundles_post_ra>
// kernel: tile.14
= control target key start
LH: loop header
LB: loop body
LE: loop exit
PB: predicated region body
PF: predicated region fallthrough
CT: control target
= control target key end

     0   :  { %s22_s0 = inlined_call_operand.vmem [shape: f32[6], index: 0, kind: input, shape index: {}]   ;;  %s23_s1 = inlined_call_operand.vmem [shape: f32[4,6], index: 1, kind: output, shape index: {}]  }
   0x1   :  { %v4_v0 = vld [vmem:[%s22_s0] ss:$0 sm:$0xff] }
   0x2   :  { %5 = vst [vmem:[%s23_s1] sm:$0xf] %v4_v0 }

// kernel: tile.0
= control target key start
LH: loop header
LB: loop body
LE: loop exit
PB: predicated region body
PF: predicated region fallthrough
CT: control target
= control target key end

     0   :  { %s50_s8 = smov 125   ;;  %vm7_vm0 = vcmask 7168   ;;  %s51_s11 = smov 126   ;;  %s91_s0 = inlined_call_operand.vmem [shape: f32[4,6], index: 0, kind: input, shape index: {}]   ;;  %s92_s1 = inlined_call_operand.vmem [shape: f32[24,1], index: 1, kind: output, shape index: {}]  }
   0x1   :  { %v4_v0 = vld [vmem:[%s91_s0] sm:$0xf]  ;;  %s49_s0 = smov 127   ;;  %s52_s12 = smov 124  }
   0x2   :  { %5 = vst [vmem:[#allocation0] sm:$0xf] %v4_v0  ;;  %s53_s13 = smov 123  }
   0x9   :  { %v9_v1 = vld [vmem:[#allocation0] sm:$0xf]  }
   0xa   :  { %v21_v2 = vld [vmem:[#allocation0] sm:$0xf]   ;;  %10 = vrot.lane.b32.xlu0 %v9_v1, %s49_s0 }
   0xb   :  { %22 = vrot.lane.b32.xlu1 %v21_v2, %s50_s8  ;;  %v6_v3 = vld [vmem:[#allocation0] sm:$0xf]  }
   0xc   :  { %v15_v4 = vld [vmem:[#allocation0] sm:$0xf]   ;;  %8 = vst.msk [vmem:[%s92_s1] ss:$6 sm:$0xf] %vm7_vm0, %v6_v3  }
   0xd   :  { %v27_v5 = vld [vmem:[#allocation0] sm:$0xf]  }
   0xe   :  { %16 = vrot.lane.b32.xlu0 %v15_v4, %s51_s11  ;;  %v33_v6 = vld [vmem:[#allocation0] sm:$0xf]  }
   0xf   :  { %28 = vrot.lane.b32.xlu1 %v27_v5, %s52_s12 }
  0x12   :  { %34 = vrot.lane.b32.xlu0 %v33_v6, %s53_s13 }
  0x7c   :  { %v11_v7 = vpop.permute.xlu0 %10  }
  0x7d   :  { %v23_v8 = vpop.permute.xlu1 %22   ;;  %39 = vst.msk [vmem:[%s92_s1 + $0x1] ss:$6 sm:$0xf] %vm7_vm0, %v11_v7  }
  0x7e   :  { %41 = vst.msk [vmem:[%s92_s1 + $0x3] ss:$6 sm:$0xf] %vm7_vm0, %v23_v8  }
  0x80   :  { %v17_v9 = vpop.permute.xlu0 %16  }
  0x81   :  { %v29_v10 = vpop.permute.xlu1 %28   ;;  %40 = vst.msk [vmem:[%s92_s1 + $0x2] ss:$6 sm:$0xf] %vm7_vm0, %v17_v9  }
  0x82   :  { %42 = vst.msk [vmem:[%s92_s1 + $0x4] ss:$6 sm:$0xf] %vm7_vm0, %v29_v10  }
  0x84   :  { %v35_v11 = vpop.permute.xlu0 %34  }
  0x85   :  { %43 = vst.msk [vmem:[%s92_s1 + $0x5] ss:$6 sm:$0xf] %vm7_vm0, %v35_v11  }

// kernel: tile.10
= control target key start
LH: loop header
LB: loop body
LE: loop exit
PB: predicated region body
PF: predicated region fallthrough
CT: control target
= control target key end

     0   :  { %s22_s0 = inlined_call_operand.vmem [shape: f32[32], index: 0, kind: input, shape index: {}]   ;;  %s23_s1 = inlined_call_operand.vmem [shape: f32[4,32], index: 1, kind: output, shape index: {}]  }
   0x1   :  { %v4_v0 = vld [vmem:[%s22_s0] ss:$0 sm:$0xff] }
   0x2   :  { %5 = vst [vmem:[%s23_s1] sm:$0xf] %v4_v0 }

// kernel: tile.11
= control target key start
LH: loop header
LB: loop body
LE: loop exit
PB: predicated region body
PF: predicated region fallthrough
CT: control target
= control target key end

     0   :  { %vm7_vm0 = vcmask 261120   ;;  %s37_s8 = smov 32   ;;  %s38_s9 = smov 64   ;;  %vm13_vm1 = vcmask 1048320   ;;  %vm19_vm2 = vcmask 785920   ;;  %vm25_vm3 = vcmask 523520   ;;  %s55_s0 = inlined_call_operand.vmem [shape: f32[4,32], index: 0, kind: input, shape index: {}]   ;;  %s56_s1 = inlined_call_operand.vmem [shape: f32[1,128], index: 1, kind: output, shape index: {}]  }
   0x1   :  { %v4_v0 = vld [vmem:[%s55_s0] sm:$0xf]  ;;  %s36_s0 = smov 96  }
   0x2   :  { %5 = vst [vmem:[#allocation1] sm:$0xf] %v4_v0 }
   0x9   :  { %v10_v1 = vld [vmem:[#allocation1 + $0x3] sm:$0x1]   ;;  %v22_v2 = vld [vmem:[#allocation1 + $0x1] sm:$0x1]   ;;  %v6_v3 = vld [vmem:[#allocation1] sm:$0x1]  }
   0xa   :  { %11 = vrot.lane.b32.xlu0 %v10_v1, %s36_s0  ;;  %23 = vrot.lane.b32.xlu1 %v22_v2, %s37_s8  ;;  %v16_v4 = vld [vmem:[#allocation1 + $0x2] sm:$0x1]   ;;  %8 = vst.msk [vmem:[#allocation0] sm:$0x1] %vm7_vm0, %v6_v3  }
   0xe   :  { %17 = vrot.lane.b32.xlu0 %v16_v4, %s38_s9 }
  0x7c   :  { %v12_v5 = vpop.permute.xlu0 %11   ;;  %v24_v6 = vpop.permute.xlu1 %23  }
  0x7d   :  { %14 = vst.msk [vmem:[#allocation0] sm:$0x1] %vm13_vm1, %v12_v5  }
  0x80   :  { %v18_v7 = vpop.permute.xlu0 %17  }
  0x81   :  { %20 = vst.msk [vmem:[#allocation0] sm:$0x1] %vm19_vm2, %v18_v7  }
  0x82   :  { %26 = vst.msk [vmem:[#allocation0] sm:$0x1] %vm25_vm3, %v24_v6  }
  0x89   :  { %v30_v8 = vld [vmem:[#allocation0] sm:$0x1] }
  0x8a   :  { %32 = vst [vmem:[%s56_s1] sm:$0x1] %v30_v8 }

// kernel: _dqn_forward_impl.1
= control target key start
LH: loop header
LB: loop body
LE: loop exit
PB: predicated region body
PF: predicated region fallthrough
CT: control target
= control target key end

     0   :  { %s3497_s24 = smov 0   ;;  %s4241_s0 = inlined_call_operand.vmem [shape: f32[896,112], index: 0, kind: input, shape index: {}]   ;;  %s4242_s1 = inlined_call_operand.vmem [shape: f32[112,128], index: 1, kind: input, shape index: {}]   ;;  %s4243_s2 = inlined_call_operand.vmem [shape: f32[1,128], index: 2, kind: input, shape index: {}]   ;;  %s4244_s3 = inlined_call_operand.vmem [shape: f32[512,64], index: 3, kind: input, shape index: {}]   ;;  %s4245_s4 = inlined_call_operand.vmem [shape: f32[1,64], index: 4, kind: input, shape index: {}]   ;;  %s4246_s5 = inlined_call_operand.vmem [shape: f32[24,256], index: 5, kind: input, shape index: {}]   ;;  %s4247_s6 = inlined_call_operand.vmem [shape: f32[24,1], index: 6, kind: input, shape index: {}]   ;;  %s4248_s7 = inlined_call_operand.vmem [shape: f32[2,24,64], index: 7, kind: output, shape index: {}]  }
   0x1 LB: > { %s3503_s25 = sadd.s32 4294967295, %s3454_s24   ;;  %p2354_p0 = scmp.ge.s32.totalorder %s3454_s24, 1  ;;  %s3454_s24 = sphi %s3497_s24, %s17_s24  }
   0x2   : > { %p238_p1 = scmp.lt.s32.totalorder %s3454_s24, 3 }
   0x4   : > { %p239_p2 = pnand %p2354_p0, %p238_p1 }
   0x5   : > { %v337_v0 = vld [vmem:[%s4242_s1] sm:$0xff] (!%p239_p2)  ;;  %v338_v1 = vld [vmem:[%s4242_s1 + $0x8] sm:$0xff] (!%p239_p2)  ;;  %v339_v2 = vld [vmem:[%s4242_s1 + $0x10] sm:$0xff] (!%p239_p2)  ;;  %s270_s9 = smul.u32 (!%p239_p2), 56, %s3503_s25  ;;  %vm358_vm0 = vcmask (!%p239_p2), 916480   ;;  %p276_p4 = scmp.lt.s32.totalorder (!%p239_p2), %s3503_s25, 1 }
   0x6   : > { %242 = sbr.rel (%p239_p2) target bundleno = 893 (0x37d), region = 48  ;;  %v3152_v3 = vpack.c.bf16 (!%p239_p2), %v338_v1, %v337_v0  ;;  %v340_v4 = vld [vmem:[%s4242_s1 + $0x18] sm:$0xff] (!%p239_p2)  ;;  %v341_v6 = vld [vmem:[%s4242_s1 + $0x20] sm:$0xff] (!%p239_p2)  ;;  %v342_v7 = vld [vmem:[%s4242_s1 + $0x28] sm:$0xff] (!%p239_p2)  ;;  %vm2291_vm1 = vcmask (!%p239_p2), 523264  }
   0x7   : > { %v3156_v5 = vpack.c.bf16 (!%p239_p2), %v340_v4, %v339_v2  ;;  %p271_p3 = scmp.lt.s32.totalorder (!%p239_p2), %s270_s9, 111  ;;  %v3160_v8 = vpack.c.bf16 (!%p239_p2), %v342_v7, %v341_v6  ;;  %v343_v9 = vld [vmem:[%s4242_s1 + $0x30] sm:$0xff] (!%p239_p2)  ;;  %v344_v10 = vld [vmem:[%s4242_s1 + $0x38] sm:$0xff] (!%p239_p2)  ;;  %v1016_v11 = vld [vmem:[%s4244_s3] sm:$0xff] (!%p239_p2) }
   0x8   : > { %3153 = vmatprep.subr.bf16.mxu0 (!%p239_p2), %v3152_v3  ;;  %v1017_v12 = vld [vmem:[%s4244_s3 + $0x8] sm:$0xff] (!%p239_p2)  ;;  %v3164_v15 = vpack.c.bf16 (!%p239_p2), %v344_v10, %v343_v9  ;;  %v345_v16 = vld [vmem:[%s4242_s1 + $0x40] sm:$0xff] (!%p239_p2)  ;;  %v347_v19 = vld [vmem:[%s4242_s1 + $0x50] sm:$0xff] (!%p239_p2) }
   0x9   : > { %3155 = vmatpush3.bf16.msra.mxu0 (!%p239_p2), %v3152_v3  ;;  %v3212_v14 = vpack.c.bf16 (!%p239_p2), %v1017_v12, %v1016_v11  ;;  %v346_v17 = vld [vmem:[%s4242_s1 + $0x48] sm:$0xff] (!%p239_p2)  ;;  %v348_v20 = vld [vmem:[%s4242_s1 + $0x58] sm:$0xff] (!%p239_p2)  ;;  %v349_v22 = vld [vmem:[%s4242_s1 + $0x60] sm:$0xff] (!%p239_p2) }
   0xa   : > { %3157 = vmatprep.subr.bf16.mxu0 (!%p239_p2), %v3156_v5  ;;  %v3168_v18 = vpack.c.bf16 (!%p239_p2), %v346_v17, %v345_v16  ;;  %v3172_v21 = vpack.c.bf16 (!%p239_p2), %v348_v20, %v347_v19  ;;  %v350_v23 = vld [vmem:[%s4242_s1 + $0x68] sm:$0xff] (!%p239_p2)  ;;  %v1018_v25 = vld [vmem:[%s4244_s3 + $0x10] sm:$0xff] (!%p239_p2)  ;;  %v1019_v26 = vld [vmem:[%s4244_s3 + $0x18] sm:$0xff] (!%p239_p2) }
   0xb   : > { %3213 = vmatprep.subr.bf16.mxu1 (!%p239_p2), %v3212_v14  ;;  %v3176_v24 = vpack.c.bf16 (!%p239_p2), %v350_v23, %v349_v22  ;;  %v1020_v27 = vld [vmem:[%s4244_s3 + $0x20] sm:$0xff] (!%p239_p2)  ;;  %v1021_v28 = vld [vmem:[%s4244_s3 + $0x28] sm:$0xff] (!%p239_p2)  ;;  %v3216_v31 = vpack.c.bf16 (!%p239_p2), %v1019_v26, %v1018_v25  ;;  %v1022_v34 = vld [vmem:[%s4244_s3 + $0x30] sm:$0xff] (!%p239_p2) }
   0xc   : > { %3215 = vmatpush3.bf16.msra.mxu1 (!%p239_p2), %v3212_v14  ;;  %v3220_v32 = vpack.c.bf16 (!%p239_p2), %v1021_v28, %v1020_v27  ;;  %v1040_v33 = vld [vmem:[%s4244_s3 + $0x80] sm:$0xff] (!%p239_p2)  ;;  %v1023_v35 = vld [vmem:[%s4244_s3 + $0x38] sm:$0xff] (!%p239_p2)  ;;  %v1041_v36 = vld [vmem:[%s4244_s3 + $0x88] sm:$0xff] (!%p239_p2) }
   0xd   : > { %s4250_s9 = smov (!%p271_p3, %s270_s9), 111  ;;  %3159 = vmatpush3.bf16.msra.mxu0 %v3156_v5  ;;  %3217 = vmatprep.subr.bf16.mxu1 %v3216_v31  ;;  %v3180_v37 = vpack.c.bf16 %v1041_v36, %v1040_v33  ;;  %v1042_v38 = vld [vmem:[%s4244_s3 + $0x90] sm:$0xff]  ;;  %v1043_v39 = vld [vmem:[%s4244_s3 + $0x98] sm:$0xff]  ;;  %v3224_v41 = vpack.c.bf16 %v1023_v35, %v1022_v34  ;;  %v1024_v43 = vld [vmem:[%s4244_s3 + $0x40] sm:$0xff]  ;;  %s4252_s25 = smov (!%p276_p4, %s3503_s25), 1 }
   0xe   : > { %s2355_s20 = sshll.u32 %s4250_s9, 3  ;;  %3161 = vmatprep.subr.bf16.mxu0 %v3160_v8  ;;  %v1025_v44 = vld [vmem:[%s4244_s3 + $0x48] sm:$0xff]  ;;  %v3184_v45 = vpack.c.bf16 %v1043_v39, %v1042_v38  ;;  %v1044_v46 = vld [vmem:[%s4244_s3 + $0xa0] sm:$0xff]  ;;  %v1026_v51 = vld [vmem:[%s4244_s3 + $0x50] sm:$0xff]  ;;  %s3436_s21 = smul.u32 24, %s4252_s25 }
   0xf   : > { %s3535_s23 = scalar_lea.vmem %s4241_s0, %s2355_s20  ;;  %v1045_v47 = vld [vmem:[%s4244_s3 + $0xa8] sm:$0xff]  ;;  %v3228_v49 = vpack.c.bf16 %v1025_v44, %v1024_v43  ;;  %v1027_v52 = vld [vmem:[%s4244_s3 + $0x58] sm:$0xff]  ;;  %v1028_v57 = vld [vmem:[%s4244_s3 + $0x60] sm:$0xff] }
  0x10   : > { %v281_v13 = vld [vmem:[%s3535_s23] sm:$0xff]  ;;  %v282_v29 = vld [vmem:[%s3535_s23 + $0x8] sm:$0xff]  ;;  %v283_v30 = vld [vmem:[%s3535_s23 + $0x10] sm:$0xff]  ;;  %3219 = vmatpush3.bf16.msra.mxu1 %v3216_v31  ;;  %v3188_v53 = vpack.c.bf16 %v1045_v47, %v1044_v46  ;;  %v3232_v55 = vpack.c.bf16 %v1027_v52, %v1026_v51  ;;  %s280_s27 = scalar_lea.vmem %s4248_s7, %s3436_s21 }
  0x11   : > { %2748 = vmatprep.mubr.msk.f32.mxu0 %vm358_vm0, %v281_v13  ;;  %3163 = vmatpush3.bf16.msra.mxu0 %v3160_v8  ;;  %v284_v40 = vld [vmem:[%s3535_s23 + $0x18] sm:$0xff]  ;;  %v285_v42 = vld [vmem:[%s3535_s23 + $0x20] sm:$0xff]  ;;  %v286_v48 = vld [vmem:[%s3535_s23 + $0x28] sm:$0xff] }
  0x12   : > { %3165 = vmatprep.subr.bf16.mxu0 %v3164_v15  ;;  %3221 = vmatprep.subr.bf16.mxu1 %v3220_v32  ;;  %v287_v50 = vld [vmem:[%s3535_s23 + $0x30] sm:$0xff]  ;;  %v288_v54 = vld [vmem:[%s3535_s23 + $0x38] sm:$0xff]  ;;  %v289_v56 = vld [vmem:[%s3535_s23 + $0x40] sm:$0xff] }
  0x13   : > { %v1029_v58 = vld [vmem:[%s4244_s3 + $0x68] sm:$0xff]  ;;  %v291_v61 = vld [vmem:[%s3535_s23 + $0x50] sm:$0xff]  ;;  %v292_v62 = vld [vmem:[%s3535_s23 + $0x58] sm:$0xff] }
  0x14   : > { %3223 = vmatpush3.bf16.msra.mxu1 %v3220_v32  ;;  %v290_v59 = vld [vmem:[%s3535_s23 + $0x48] sm:$0xff]  ;;  %v3236_v60 = vpack.c.bf16 %v1029_v58, %v1028_v57  ;;  %v293_v63 = vld [vmem:[%s3535_s23 + $0x60] sm:$0xff]  ;;  %v295_v1 = vld [vmem:[%s3535_s23 + $0x70] sm:$0xff] }
  0x15   : > { %3167 = vmatpush3.bf16.msra.mxu0 %v3164_v15  ;;  %3225 = vmatprep.subr.bf16.mxu1 %v3224_v41  ;;  %v294_v0 = vld [vmem:[%s3535_s23 + $0x68] sm:$0xff]  ;;  %v296_v2 = vld [vmem:[%s3535_s23 + $0x78] sm:$0xff]  ;;  %v297_v3 = vld [vmem:[%s3535_s23 + $0x80] sm:$0xff] }
  0x16   : > { %3169 = vmatprep.subr.bf16.mxu0 %v3168_v18  ;;  %v298_v4 = vld [vmem:[%s3535_s23 + $0x88] sm:$0xff]  ;;  %v299_v5 = vld [vmem:[%s3535_s23 + $0x90] sm:$0xff]  ;;  %v300_v6 = vld [vmem:[%s3535_s23 + $0x98] sm:$0xff] }
  0x17   : > { %v301_v7 = vld [vmem:[%s3535_s23 + $0xa0] sm:$0xff]  ;;  %v302_v8 = vld [vmem:[%s3535_s23 + $0xa8] sm:$0xff]  ;;  %v303_v9 = vld [vmem:[%s3535_s23 + $0xb0] sm:$0xff] }
  0x18   : > { %3227 = vmatpush3.bf16.msra.mxu1 %v3224_v41  ;;  %v304_v10 = vld [vmem:[%s3535_s23 + $0xb8] sm:$0xff]  ;;  %v305_v11 = vld [vmem:[%s3535_s23 + $0xc0] sm:$0xff]  ;;  %v306_v12 = vld [vmem:[%s3535_s23 + $0xc8] sm:$0xff] }
  0x19   : > { %3171 = vmatpush3.bf16.msra.mxu0 %v3168_v18  ;;  %3229 = vmatprep.subr.bf16.mxu1 %v3228_v49  ;;  %v307_v13 = vld [vmem:[%s3535_s23 + $0xd0] sm:$0xff]  ;;  %v308_v14 = vld [vmem:[%s3535_s23 + $0xd8] sm:$0xff]  ;;  %v309_v15 = vld [vmem:[%s3535_s23 + $0xe0] sm:$0xff] }
  0x1a   : > { %3173 = vmatprep.subr.bf16.mxu0 %v3172_v21  ;;  %v310_v16 = vld [vmem:[%s3535_s23 + $0xe8] sm:$0xff]  ;;  %v311_v17 = vld [vmem:[%s3535_s23 + $0xf0] sm:$0xff]  ;;  %v312_v18 = vld [vmem:[%s3535_s23 + $0xf8] sm:$0xff] }
  0x1b   : > { %v313_v19 = vld [vmem:[%s3535_s23 + $0x100] sm:$0xff]  ;;  %v314_v20 = vld [vmem:[%s3535_s23 + $0x108] sm:$0xff]  ;;  %v316_v22 = vld [vmem:[%s3535_s23 + $0x118] sm:$0xff] }
  0x1c   : > { %3231 = vmatpush3.bf16.msra.mxu1 %v3228_v49  ;;  %v317_v23 = vld [vmem:[%s3535_s23 + $0x120] sm:$0xff]  ;;  %v319_v25 = vld [vmem:[%s3535_s23 + $0x130] sm:$0xff]  ;;  %v320_v26 = vld [vmem:[%s3535_s23 + $0x138] sm:$0xff] }
  0x1d   : > { %3175 = vmatpush3.bf16.msra.mxu0 %v3172_v21  ;;  %3233 = vmatprep.subr.bf16.mxu1 %v3232_v55  ;;  %v315_v21 = vld [vmem:[%s3535_s23 + $0x110] sm:$0xff]  ;;  %v321_v27 = vld [vmem:[%s3535_s23 + $0x140] sm:$0xff]  ;;  %v322_v28 = vld [vmem:[%s3535_s23 + $0x148] sm:$0xff] }
  0x1e   : > { %3177 = vmatprep.subr.bf16.mxu0 %v3176_v24  ;;  %v325_v31 = vld [vmem:[%s3535_s23 + $0x160] sm:$0xff]  ;;  %v1046_v32 = vld [vmem:[%s4244_s3 + $0xb0] sm:$0xff]  ;;  %v1047_v33 = vld [vmem:[%s4244_s3 + $0xb8] sm:$0xff] }
  0x1f   : > { %v3192_v34 = vpack.c.bf16 %v1047_v33, %v1046_v32  ;;  %v1030_v35 = vld [vmem:[%s4244_s3 + $0x70] sm:$0xff]  ;;  %v1031_v36 = vld [vmem:[%s4244_s3 + $0x78] sm:$0xff]  ;;  %v1049_v41 = vld [vmem:[%s4244_s3 + $0xc8] sm:$0xff] }
  0x20   : > { %3235 = vmatpush3.bf16.msra.mxu1 %v3232_v55  ;;  %v3240_v38 = vpack.c.bf16 %v1031_v36, %v1030_v35  ;;  %v327_v39 = vld [vmem:[%s3535_s23 + $0x170] sm:$0xff]  ;;  %v328_v43 = vld [vmem:[%s3535_s23 + $0x178] sm:$0xff]  ;;  %v329_v44 = vld [vmem:[%s3535_s23 + $0x180] sm:$0xff] }
  0x21   : > { %3179 = vmatpush3.bf16.msra.mxu0 %v3176_v24  ;;  %3237 = vmatprep.subr.bf16.mxu1 %v3236_v60  ;;  %v318_v24 = vld [vmem:[%s3535_s23 + $0x128] sm:$0xff]  ;;  %v1051_v46 = vld [vmem:[%s4244_s3 + $0xd8] sm:$0xff]  ;;  %v331_v49 = vld [vmem:[%s3535_s23 + $0x190] sm:$0xff] }
  0x22   : > { %3181 = vmatprep.subr.bf16.mxu0 %v3180_v37  ;;  %v1053_v51 = vld [vmem:[%s4244_s3 + $0xe8] sm:$0xff]  ;;  %v1054_v55 = vld [vmem:[%s4244_s3 + $0xf0] sm:$0xff]  ;;  %v1546_v32 = vld [vmem:[%s4244_s3 + $0x140] sm:$0xff] }
  0x23   : > { %v334_v58 = vld [vmem:[%s3535_s23 + $0x1a8] sm:$0xff] }
  0x24   : > { %2749 = vmatmul.mubr.msk.f32.vlgmr.msra.gmra.mrb[0].mxu0 %vm358_vm0, %v282_v29  ;;  %3239 = vmatpush3.bf16.msra.mxu1 %v3236_v60  ;;  %v323_v29 = vld [vmem:[%s3535_s23 + $0x150] sm:$0xff]  ;;  %v336_v60 = vld [vmem:[%s3535_s23 + $0x1b8] sm:$0xff]  ;;  %v1547_v33 = vld [vmem:[%s4244_s3 + $0x148] sm:$0xff] }
  0x25   : > { %2751 = vmatprep.mubr.msk.f32.mxu0 %vm358_vm0, %v283_v30  ;;  %3183 = vmatpush3.bf16.msra.mxu0 %v3180_v37  ;;  %v324_v30 = vld [vmem:[%s3535_s23 + $0x158] sm:$0xff]  ;;  %v326_v37 = vld [vmem:[%s3535_s23 + $0x168] sm:$0xff] }
  0x26   : > { %3185 = vmatprep.subr.bf16.mxu0 %v3184_v45  ;;  %3241 = vmatprep.subr.bf16.mxu1 %v3240_v38 }
  0x28   : > { %2752 = vmatmul.mubr.msk.f32.gmra.mrb[2].mxu0 %vm358_vm0, %v284_v40  ;;  %v1048_v40 = vld [vmem:[%s4244_s3 + $0xc0] sm:$0xff]  ;;  %3243 = vmatpush3.bf16.msra.mxu1 %v3240_v38 }
  0x29   : > { %2754 = vmatprep.mubr.msk.f32.mxu0 %vm358_vm0, %v285_v42  ;;  %3187 = vmatpush3.bf16.msra.mxu0 %v3184_v45  ;;  %v3196_v42 = vpack.c.bf16 %v1049_v41, %v1048_v40  ;;  %v1050_v45 = vld [vmem:[%s4244_s3 + $0xd0] sm:$0xff] }
  0x2a   : > { %3189 = vmatprep.subr.bf16.mxu0 %v3188_v53  ;;  %v3200_v47 = vpack.c.bf16 %v1051_v46, %v1050_v45  ;;  %v1548_v41 = vld [vmem:[%s4244_s3 + $0x150] sm:$0xff] }
  0x2c   : > { %2755 = vmatmul.mubr.msk.f32.gmra.mrb[4].mxu0 %vm358_vm0, %v286_v48  ;;  %v330_v48 = vld [vmem:[%s3535_s23 + $0x188] sm:$0xff] }
  0x2d   : > { %2757 = vmatprep.mubr.msk.f32.mxu0 %vm358_vm0, %v287_v50  ;;  %3191 = vmatpush3.bf16.msra.mxu0 %v3188_v53  ;;  %v1052_v50 = vld [vmem:[%s4244_s3 + $0xe0] sm:$0xff]  ;;  %v332_v53 = vld [vmem:[%s3535_s23 + $0x198] sm:$0xff] }
  0x2e   : > { %3193 = vmatprep.subr.bf16.mxu0 %v3192_v34  ;;  %v3204_v52 = vpack.c.bf16 %v1053_v51, %v1052_v50  ;;  %v1550_v50 = vld [vmem:[%s4244_s3 + $0x160] sm:$0xff]  ;;  %v1551_v51 = vld [vmem:[%s4244_s3 + $0x168] sm:$0xff] }
  0x30   : > { %2758 = vmatmul.mubr.msk.f32.gmra.mrb[6].mxu0 %vm358_vm0, %v288_v54  ;;  %v333_v54 = vld [vmem:[%s3535_s23 + $0x1a0] sm:$0xff] }
  0x31   : > { %2760 = vmatprep.mubr.msk.f32.mxu0 %vm358_vm0, %v289_v56  ;;  %3195 = vmatpush3.bf16.msra.mxu0 %v3192_v34  ;;  %v1055_v56 = vld [vmem:[%s4244_s3 + $0xf8] sm:$0xff] }
  0x32   : > { %3197 = vmatprep.subr.bf16.mxu0 %v3196_v42  ;;  %v3208_v57 = vpack.c.bf16 %v1055_v56, %v1054_v55 }
  0x34   : > { %2761 = vmatmul.mubr.msk.f32.gmra.mrb[8].mxu0 %vm358_vm0, %v290_v59  ;;  %v335_v59 = vld [vmem:[%s3535_s23 + $0x1b0] sm:$0xff] }
  0x35   : > { %2763 = vmatprep.mubr.msk.f32.mxu0 %vm358_vm0, %v291_v61  ;;  %3199 = vmatpush3.bf16.msra.mxu0 %v3196_v42  ;;  %v1538_v61 = vld [vmem:[%s4244_s3 + $0x100] sm:$0xff]  ;;  %v1549_v42 = vld [vmem:[%s4244_s3 + $0x158] sm:$0xff] }
  0x36   : > { %3201 = vmatprep.subr.bf16.mxu0 %v3200_v47 }
  0x38   : > { %2764 = vmatmul.mubr.msk.f32.gmra.mrb[10].mxu0 %vm358_vm0, %v292_v62  ;;  %v1539_v62 = vld [vmem:[%s4244_s3 + $0x108] sm:$0xff] }
  0x39   : > { %2766 = vmatprep.mubr.msk.f32.mxu0 %vm358_vm0, %v293_v63  ;;  %3203 = vmatpush3.bf16.msra.mxu0 %v3200_v47  ;;  %v3244_v63 = vpack.c.bf16 %v1539_v62, %v1538_v61 }
  0x3a   : > { %3205 = vmatprep.subr.bf16.mxu0 %v3204_v52 }
  0x3b   : > { %3245 = vmatprep.subr.bf16.mxu1 %v3244_v63 }
  0x3c   : > { %2767 = vmatmul.mubr.msk.f32.gmra.mrb[12].mxu0 %vm358_vm0, %v294_v0  ;;  %v3772_v0 = vld [vmem:[%s4243_s2] ss:$0 sm:$0xff] }
  0x3d   : > { %2769 = vmatprep.mubr.msk.f32.mxu0 %vm358_vm0, %v295_v1  ;;  %3207 = vmatpush3.bf16.msra.mxu0 %v3204_v52 }
  0x3e   : > { %3209 = vmatprep.subr.bf16.mxu0 %v3208_v57 }
  0x40   : > { %2770 = vmatmul.mubr.msk.f32.gmra.mrb[14].mxu0 %vm358_vm0, %v296_v2 }
  0x41   : > { %2772 = vmatprep.mubr.msk.f32.mxu0 %vm358_vm0, %v297_v3  ;;  %3211 = vmatpush3.bf16.msra.mxu0 %v3208_v57  ;;  %v3268_v57 = vpack.c.bf16 %v1551_v51, %v1550_v50 }
  0x44   : > { %2773 = vmatmul.mubr.msk.f32.gmra.mrb[16].mxu0 %vm358_vm0, %v298_v4 }
  0x45   : > { %2775 = vmatprep.mubr.msk.f32.mxu0 %vm358_vm0, %v299_v5  ;;  %v1540_v5 = vld [vmem:[%s4244_s3 + $0x110] sm:$0xff] }
  0x48   : > { %2776 = vmatmul.mubr.msk.f32.gmra.mrb[18].mxu0 %vm358_vm0, %v300_v6  ;;  %v1541_v6 = vld [vmem:[%s4244_s3 + $0x118] sm:$0xff] }
  0x49   : > { %2778 = vmatprep.mubr.msk.f32.mxu0 %vm358_vm0, %v301_v7 }
  0x4c   : > { %2779 = vmatmul.mubr.msk.f32.gmra.mrb[20].mxu0 %vm358_vm0, %v302_v8 }
  0x4d   : > { %2781 = vmatprep.mubr.msk.f32.mxu0 %vm358_vm0, %v303_v9 }
  0x50   : > { %2782 = vmatmul.mubr.msk.f32.gmra.mrb[22].mxu0 %vm358_vm0, %v304_v10 }
  0x51   : > { %2784 = vmatprep.mubr.msk.f32.mxu0 %vm358_vm0, %v305_v11 }
  0x54   : > { %2785 = vmatmul.mubr.msk.f32.gmra.mrb[24].mxu0 %vm358_vm0, %v306_v12  ;;  %v3248_v12 = vpack.c.bf16 %v1541_v6, %v1540_v5  ;;  %v1843_v5 = vld [vmem:[%s4244_s3 + $0x180] sm:$0xff]  ;;  %v1844_v6 = vld [vmem:[%s4244_s3 + $0x188] sm:$0xff] }
  0x55   : > { %2787 = vmatprep.mubr.msk.f32.mxu0 %vm358_vm0, %v307_v13 }
  0x58   : > { %2788 = vmatmul.mubr.msk.f32.gmra.mrb[26].mxu0 %vm358_vm0, %v308_v14  ;;  %v1542_v14 = vld [vmem:[%s4244_s3 + $0x120] sm:$0xff] }
  0x59   : > { %2790 = vmatprep.mubr.msk.f32.mxu0 %vm358_vm0, %v309_v15  ;;  %v1543_v15 = vld [vmem:[%s4244_s3 + $0x128] sm:$0xff] }
  0x5c   : > { %2791 = vmatmul.mubr.msk.f32.gmra.mrb[28].mxu0 %vm358_vm0, %v310_v16 }
  0x5d   : > { %2793 = vmatprep.mubr.msk.f32.mxu0 %vm358_vm0, %v311_v17 }
  0x60   : > { %2794 = vmatmul.mubr.msk.f32.gmra.mrb[30].mxu0 %vm358_vm0, %v312_v18 }
  0x61   : > { %2796 = vmatprep.mubr.msk.f32.mxu0 %vm358_vm0, %v313_v19 }
  0x64   : > { %2797 = vmatmul.mubr.msk.f32.gmra.mrb[32].mxu0 %vm358_vm0, %v314_v20 }
  0x65   : > { %2799 = vmatprep.mubr.msk.f32.mxu0 %vm358_vm0, %v315_v21  ;;  %v3252_v21 = vpack.c.bf16 %v1543_v15, %v1542_v14 }
  0x68   : > { %2800 = vmatmul.mubr.msk.f32.gmra.mrb[34].mxu0 %vm358_vm0, %v316_v22 }
  0x69   : > { %2802 = vmatprep.mubr.msk.f32.mxu0 %vm358_vm0, %v317_v23  ;;  %v1544_v23 = vld [vmem:[%s4244_s3 + $0x130] sm:$0xff] }
  0x6c   : > { %2803 = vmatmul.mubr.msk.f32.gmra.mrb[36].mxu0 %vm358_vm0, %v318_v24  ;;  %v1545_v24 = vld [vmem:[%s4244_s3 + $0x138] sm:$0xff] }
  0x6d   : > { %2805 = vmatprep.mubr.msk.f32.mxu0 %vm358_vm0, %v319_v25 }
  0x70   : > { %2806 = vmatmul.mubr.msk.f32.gmra.mrb[38].mxu0 %vm358_vm0, %v320_v26 }
  0x71   : > { %2808 = vmatprep.mubr.msk.f32.mxu0 %vm358_vm0, %v321_v27 }
  0x74   : > { %2809 = vmatmul.mubr.msk.f32.gmra.mrb[40].mxu0 %vm358_vm0, %v322_v28 }
  0x75   : > { %2811 = vmatprep.mubr.msk.f32.mxu0 %vm358_vm0, %v323_v29 }
  0x78   : > { %2812 = vmatmul.mubr.msk.f32.gmra.mrb[42].mxu0 %vm358_vm0, %v324_v30  ;;  %v3256_v30 = vpack.c.bf16 %v1545_v24, %v1544_v23 }
  0x79   : > { %2814 = vmatprep.mubr.msk.f32.mxu0 %vm358_vm0, %v325_v31 }
  0x7c   : > { %2815 = vmatmul.mubr.msk.f32.gmra.mrb[44].mxu0 %vm358_vm0, %v326_v37 }
  0x7d   : > { %2817 = vmatprep.mubr.msk.f32.mxu0 %vm358_vm0, %v327_v39  ;;  %v3260_v39 = vpack.c.bf16 %v1547_v33, %v1546_v32 }
  0x80   : > { %2818 = vmatmul.mubr.msk.f32.gmra.mrb[46].mxu0 %vm358_vm0, %v328_v43 }
  0x81   : > { %2820 = vmatprep.mubr.msk.f32.mxu0 %vm358_vm0, %v329_v44 }
  0x84   : > { %2821 = vmatmul.mubr.msk.f32.gmra.mrb[48].mxu0 %vm358_vm0, %v330_v48  ;;  %v3264_v48 = vpack.c.bf16 %v1549_v42, %v1548_v41 }
  0x85   : > { %2823 = vmatprep.mubr.msk.f32.mxu0 %vm358_vm0, %v331_v49 }
  0x88   : > { %2824 = vmatmul.mubr.msk.f32.gmra.mrb[50].mxu0 %vm358_vm0, %v332_v53 }
  0x89   : > { %2826 = vmatprep.mubr.msk.f32.mxu0 %vm358_vm0, %v333_v54 }
  0x8c   : > { %2827 = vmatmul.mubr.msk.f32.gmra.mrb[52].mxu0 %vm358_vm0, %v334_v58 }
  0x8d   : > { %2829 = vmatprep.mubr.msk.f32.mxu0 %vm358_vm0, %v335_v59  ;;  %v1552_v59 = vld [vmem:[%s4244_s3 + $0x170] sm:$0xff] }
  0x90   : > { %2830 = vmatmul.mubr.msk.f32.gmra.mrb[54].mxu0 %vm358_vm0, %v336_v60  ;;  %v1553_v60 = vld [vmem:[%s4244_s3 + $0x178] sm:$0xff] }
  0xf7   : > { %v2750_v1 = vpop.f32.mrb[0].mxu0 }
  0xf8   : > { %v599_v2 = vadd.f32 %v2750_v1, %v3772_v0  ;;  %v593_v3 = vpop.f32.mrb[1].mxu0 }
  0xf9   : > { %v594_v4 = vadd.f32 %v3772_v0, %v593_v3  ;;  %v3272_v3 = vpack.c.bf16 %v1553_v60, %v1552_v59 }
  0xfa   : > { %v873_v9 = vmax.f32 %v599_v2, 0.0 }
  0xfb   : > { %v2753_v7 = vpop.f32.mrb[2].mxu0  ;;  %v872_v8 = vmax.f32 %v594_v4, 0.0 }
  0xfc   : > { %v609_v10 = vadd.f32 %v2753_v7, %v3772_v0  ;;  %v603_v11 = vpop.f32.mrb[3].mxu0 }
  0xfd   : > { %v604_v13 = vadd.f32 %v3772_v0, %v603_v11  ;;  %2944 = vmatprep.mubr.f32.mxu1 %v872_v8 }
  0xfe   : > { %2945 = vmatmul.mubr.f32.vlgmr.msra.gmra.mrb[0].mxu1 %v873_v9  ;;  %v875_v18 = vmax.f32 %v609_v10, 0.0 }
  0xff   : > { %v874_v16 = vmax.f32 %v604_v13, 0.0  ;;  %v2756_v17 = vpop.f32.mrb[4].mxu0  ;;  %3247 = vmatpush3.bf16.msra.mxu1 %v3244_v63 }
 0x100   : > { %v619_v19 = vadd.f32 %v2756_v17, %v3772_v0  ;;  %v613_v20 = vpop.f32.mrb[5].mxu0  ;;  %3249 = vmatprep.subr.bf16.mxu1 %v3248_v12 }
 0x101   : > { %v614_v22 = vadd.f32 %v3772_v0, %v613_v20  ;;  %2947 = vmatprep.mubr.f32.mxu1 %v874_v16 }
 0x102   : > { %2948 = vmatmul.mubr.f32.gmra.mrb[2].mxu1 %v875_v18  ;;  %v877_v27 = vmax.f32 %v619_v19, 0.0 }
 0x103   : > { %v876_v25 = vmax.f32 %v614_v22, 0.0  ;;  %v2759_v26 = vpop.f32.mrb[6].mxu0  ;;  %3251 = vmatpush3.bf16.msra.mxu1 %v3248_v12  ;;  %v3839_v12 = vpack.c.bf16 %v1844_v6, %v1843_v5 }
 0x104   : > { %v629_v28 = vadd.f32 %v2759_v26, %v3772_v0  ;;  %v623_v29 = vpop.f32.mrb[7].mxu0  ;;  %3253 = vmatprep.subr.bf16.mxu1 %v3252_v21 }
 0x105   : > { %v624_v31 = vadd.f32 %v3772_v0, %v623_v29  ;;  %2950 = vmatprep.mubr.f32.mxu1 %v876_v25 }
 0x106   : > { %2951 = vmatmul.mubr.f32.gmra.mrb[4].mxu1 %v877_v27  ;;  %v879_v36 = vmax.f32 %v629_v28, 0.0 }
 0x107   : > { %v878_v34 = vmax.f32 %v624_v31, 0.0  ;;  %v2762_v35 = vpop.f32.mrb[8].mxu0  ;;  %3255 = vmatpush3.bf16.msra.mxu1 %v3252_v21 }
 0x108   : > { %v639_v37 = vadd.f32 %v2762_v35, %v3772_v0  ;;  %v633_v38 = vpop.f32.mrb[9].mxu0  ;;  %3257 = vmatprep.subr.bf16.mxu1 %v3256_v30 }
 0x109   : > { %v634_v40 = vadd.f32 %v3772_v0, %v633_v38  ;;  %2953 = vmatprep.mubr.f32.mxu1 %v878_v34 }
 0x10a   : > { %2954 = vmatmul.mubr.f32.gmra.mrb[6].mxu1 %v879_v36  ;;  %v881_v45 = vmax.f32 %v639_v37, 0.0 }
 0x10b   : > { %v880_v43 = vmax.f32 %v634_v40, 0.0  ;;  %v2765_v44 = vpop.f32.mrb[10].mxu0  ;;  %3259 = vmatpush3.bf16.msra.mxu1 %v3256_v30 }
 0x10c   : > { %v649_v46 = vadd.f32 %v2765_v44, %v3772_v0  ;;  %v643_v47 = vpop.f32.mrb[11].mxu0  ;;  %3261 = vmatprep.subr.bf16.mxu1 %v3260_v39 }
 0x10d   : > { %v644_v49 = vadd.f32 %v3772_v0, %v643_v47  ;;  %2864 = vmatprep.mubr.f32.mxu0 %v880_v43  ;;  %2956 = vmatprep.mubr.f32.mxu1 %v880_v43 }
 0x10e   : > { %2865 = vmatmul.mubr.f32.vlgmr.msra.gmra.mrb[56].mxu0 %v881_v45  ;;  %2957 = vmatmul.mubr.f32.gmra.mrb[8].mxu1 %v881_v45  ;;  %v883_v54 = vmax.f32 %v649_v46, 0.0 }
 0x10f   : > { %v882_v52 = vmax.f32 %v644_v49, 0.0  ;;  %v2768_v53 = vpop.f32.mrb[12].mxu0  ;;  %3263 = vmatpush3.bf16.msra.mxu1 %v3260_v39 }
 0x110   : > { %v659_v55 = vadd.f32 %v2768_v53, %v3772_v0  ;;  %v653_v56 = vpop.f32.mrb[13].mxu0  ;;  %3265 = vmatprep.subr.bf16.mxu1 %v3264_v48 }
 0x111   : > { %v654_v58 = vadd.f32 %v3772_v0, %v653_v56  ;;  %2867 = vmatprep.mubr.f32.mxu0 %v882_v52  ;;  %2959 = vmatprep.mubr.f32.mxu1 %v882_v52 }
 0x112   : > { %2868 = vmatmul.mubr.f32.gmra.mrb[58].mxu0 %v883_v54  ;;  %2960 = vmatmul.mubr.f32.gmra.mrb[10].mxu1 %v883_v54  ;;  %v885_v63 = vmax.f32 %v659_v55, 0.0 }
 0x113   : > { %v884_v61 = vmax.f32 %v654_v58, 0.0  ;;  %v2771_v62 = vpop.f32.mrb[14].mxu0  ;;  %3267 = vmatpush3.bf16.msra.mxu1 %v3264_v48 }
 0x114   : > { %v669_v1 = vadd.f32 %v2771_v62, %v3772_v0  ;;  %v663_v2 = vpop.f32.mrb[15].mxu0  ;;  %3269 = vmatprep.subr.bf16.mxu1 %v3268_v57  ;;  %v1845_v62 = vld [vmem:[%s4244_s3 + $0x190] sm:$0xff] }
 0x115   : > { %v664_v4 = vadd.f32 %v3772_v0, %v663_v2  ;;  %2870 = vmatprep.mubr.f32.mxu0 %v884_v61  ;;  %2962 = vmatprep.mubr.f32.mxu1 %v884_v61 }
 0x116   : > { %2871 = vmatmul.mubr.f32.gmra.mrb[60].mxu0 %v885_v63  ;;  %2963 = vmatmul.mubr.f32.gmra.mrb[12].mxu1 %v885_v63  ;;  %v887_v9 = vmax.f32 %v669_v1, 0.0  ;;  %v1846_v63 = vld [vmem:[%s4244_s3 + $0x198] sm:$0xff] }
 0x117   : > { %v886_v7 = vmax.f32 %v664_v4, 0.0  ;;  %v2774_v8 = vpop.f32.mrb[16].mxu0  ;;  %3271 = vmatpush3.bf16.msra.mxu1 %v3268_v57  ;;  %v3280_v6 = vpack.c.bf16 %v1846_v63, %v1845_v62 }
 0x118   : > { %v679_v10 = vadd.f32 %v2774_v8, %v3772_v0  ;;  %v673_v11 = vpop.f32.mrb[17].mxu0  ;;  %3273 = vmatprep.subr.bf16.mxu1 %v3272_v3  ;;  %v1847_v8 = vld [vmem:[%s4244_s3 + $0x1a0] sm:$0xff] }
 0x119   : > { %v674_v13 = vadd.f32 %v3772_v0, %v673_v11  ;;  %2873 = vmatprep.mubr.f32.mxu0 %v886_v7  ;;  %2965 = vmatprep.mubr.f32.mxu1 %v886_v7 }
 0x11a   : > { %2874 = vmatmul.mubr.f32.gmra.mrb[62].mxu0 %v887_v9  ;;  %2966 = vmatmul.mubr.f32.gmra.mrb[14].mxu1 %v887_v9  ;;  %v3844_v16 = vmax.f32 %v679_v10, 0.0  ;;  %v1848_v9 = vld [vmem:[%s4244_s3 + $0x1a8] sm:$0xff] }
 0x11b   : > { %v3842_v14 = vmax.f32 %v674_v13, 0.0  ;;  %v2777_v15 = vpop.f32.mrb[18].mxu0  ;;  %3275 = vmatpush3.bf16.msra.mxu1 %v3272_v3 }
 0x11c   : > { %v689_v17 = vadd.f32 %v2777_v15, %v3772_v0  ;;  %v683_v18 = vpop.f32.mrb[19].mxu0  ;;  %3277 = vmatprep.subr.bf16.mxu1 %v3839_v12 }
 0x11d   : > { %v684_v19 = vadd.f32 %v3772_v0, %v683_v18  ;;  %2876 = vmatprep.mubr.f32.mxu0 %v3842_v14  ;;  %2968 = vmatprep.mubr.f32.mxu1 %v3842_v14 }
 0x11e   : > { %2877 = vmatmul.mubr.f32.gmra.mrb[64].mxu0 %v3844_v16  ;;  %2969 = vmatmul.mubr.f32.gmra.mrb[16].mxu1 %v3844_v16  ;;  %v3855_v22 = vmax.f32 %v689_v17, 0.0  ;;  %v3284_v17 = vpack.c.bf16 %v1848_v9, %v1847_v8 }
 0x11f   : > { %v3853_v20 = vmax.f32 %v684_v19, 0.0  ;;  %v2780_v21 = vpop.f32.mrb[20].mxu0  ;;  %v1850_v19 = vld [vmem:[%s4244_s3 + $0x1b8] sm:$0xff] }
 0x120   : > { %v699_v23 = vadd.f32 %v2780_v21, %v3772_v0  ;;  %v693_v24 = vpop.f32.mrb[21].mxu0 }
 0x121   : > { %v694_v25 = vadd.f32 %v3772_v0, %v693_v24  ;;  %2879 = vmatprep.mubr.f32.mxu0 %v3853_v20  ;;  %2971 = vmatprep.mubr.f32.mxu1 %v3853_v20 }
 0x122   : > { %2880 = vmatmul.mubr.f32.gmra.mrb[66].mxu0 %v3855_v22  ;;  %2972 = vmatmul.mubr.f32.gmra.mrb[18].mxu1 %v3855_v22  ;;  %v3865_v28 = vmax.f32 %v699_v23, 0.0 }
 0x123   : > { %v3863_v26 = vmax.f32 %v694_v25, 0.0  ;;  %v2783_v27 = vpop.f32.mrb[22].mxu0 }
 0x124   : > { %v709_v29 = vadd.f32 %v2783_v27, %v3772_v0  ;;  %v703_v30 = vpop.f32.mrb[23].mxu0 }
 0x125   : > { %v704_v31 = vadd.f32 %v3772_v0, %v703_v30  ;;  %2882 = vmatprep.mubr.f32.mxu0 %v3863_v26  ;;  %2974 = vmatprep.mubr.f32.mxu1 %v3863_v26 }
 0x126   : > { %2883 = vmatmul.mubr.f32.gmra.mrb[68].mxu0 %v3865_v28  ;;  %2975 = vmatmul.mubr.f32.gmra.mrb[20].mxu1 %v3865_v28  ;;  %v3875_v34 = vmax.f32 %v709_v29, 0.0 }
 0x127   : > { %v3873_v32 = vmax.f32 %v704_v31, 0.0  ;;  %v2786_v33 = vpop.f32.mrb[24].mxu0 }
 0x128   : > { %v719_v35 = vadd.f32 %v2786_v33, %v3772_v0  ;;  %v713_v36 = vpop.f32.mrb[25].mxu0 }
 0x129   : > { %v714_v37 = vadd.f32 %v3772_v0, %v713_v36  ;;  %2885 = vmatprep.mubr.f32.mxu0 %v3873_v32  ;;  %2977 = vmatprep.mubr.f32.mxu1 %v3873_v32  ;;  %v1853_v36 = vld [vmem:[%s4244_s3 + $0x1d0] sm:$0xff] }
 0x12a   : > { %2886 = vmatmul.mubr.f32.gmra.mrb[70].mxu0 %v3875_v34  ;;  %2978 = vmatmul.mubr.f32.gmra.mrb[22].mxu1 %v3875_v34  ;;  %v3885_v40 = vmax.f32 %v719_v35, 0.0 }
 0x12b   : > { %v3883_v38 = vmax.f32 %v714_v37, 0.0  ;;  %v2789_v39 = vpop.f32.mrb[26].mxu0 }
 0x12c   : > { %v729_v41 = vadd.f32 %v2789_v39, %v3772_v0  ;;  %v723_v42 = vpop.f32.mrb[27].mxu0 }
 0x12d   : > { %v724_v43 = vadd.f32 %v3772_v0, %v723_v42  ;;  %2888 = vmatprep.mubr.f32.mxu0 %v3883_v38  ;;  %2980 = vmatprep.mubr.f32.mxu1 %v3883_v38  ;;  %v1856_v42 = vld [vmem:[%s4244_s3 + $0x1e8] sm:$0xff] }
 0x12e   : > { %2889 = vmatmul.mubr.f32.gmra.mrb[72].mxu0 %v3885_v40  ;;  %2981 = vmatmul.mubr.f32.gmra.mrb[24].mxu1 %v3885_v40  ;;  %v3895_v46 = vmax.f32 %v729_v41, 0.0  ;;  %v1855_v41 = vld [vmem:[%s4244_s3 + $0x1e0] sm:$0xff] }
 0x12f   : > { %v3893_v44 = vmax.f32 %v724_v43, 0.0  ;;  %v2792_v45 = vpop.f32.mrb[28].mxu0 }
 0x130   : > { %v739_v47 = vadd.f32 %v2792_v45, %v3772_v0  ;;  %v733_v48 = vpop.f32.mrb[29].mxu0  ;;  %v3300_v45 = vpack.c.bf16 %v1856_v42, %v1855_v41 }
 0x131   : > { %v734_v49 = vadd.f32 %v3772_v0, %v733_v48  ;;  %2891 = vmatprep.mubr.f32.mxu0 %v3893_v44  ;;  %2983 = vmatprep.mubr.f32.mxu1 %v3893_v44  ;;  %v1858_v48 = vld [vmem:[%s4244_s3 + $0x1f8] sm:$0xff] }
 0x132   : > { %2892 = vmatmul.mubr.f32.gmra.mrb[74].mxu0 %v3895_v46  ;;  %2984 = vmatmul.mubr.f32.gmra.mrb[26].mxu1 %v3895_v46  ;;  %v3905_v52 = vmax.f32 %v739_v47, 0.0  ;;  %v1857_v47 = vld [vmem:[%s4244_s3 + $0x1f0] sm:$0xff] }
 0x133   : > { %v3903_v50 = vmax.f32 %v734_v49, 0.0  ;;  %v2795_v51 = vpop.f32.mrb[30].mxu0 }
 0x134   : > { %v749_v53 = vadd.f32 %v2795_v51, %v3772_v0  ;;  %v743_v54 = vpop.f32.mrb[31].mxu0 }
 0x135   : > { %v744_v55 = vadd.f32 %v3772_v0, %v743_v54  ;;  %2894 = vmatprep.mubr.f32.mxu0 %v3903_v50  ;;  %2986 = vmatprep.mubr.f32.mxu1 %v3903_v50 }
 0x136   : > { %2895 = vmatmul.mubr.f32.gmra.mrb[76].mxu0 %v3905_v52  ;;  %2987 = vmatmul.mubr.f32.gmra.mrb[28].mxu1 %v3905_v52  ;;  %v3915_v58 = vmax.f32 %v749_v53, 0.0  ;;  %v3304_v53 = vpack.c.bf16 %v1858_v48, %v1857_v47 }
 0x137   : > { %v3913_v56 = vmax.f32 %v744_v55, 0.0  ;;  %v2798_v57 = vpop.f32.mrb[32].mxu0 }
 0x138   : > { %v759_v59 = vadd.f32 %v2798_v57, %v3772_v0  ;;  %v753_v60 = vpop.f32.mrb[33].mxu0 }
 0x139   : > { %2897 = vmatprep.mubr.f32.mxu0 %v3913_v56  ;;  %2989 = vmatprep.mubr.f32.mxu1 %v3913_v56  ;;  %v754_v61 = vadd.f32 %v3772_v0, %v753_v60 }
 0x13a   : > { %2898 = vmatmul.mubr.f32.gmra.mrb[78].mxu0 %v3915_v58  ;;  %2990 = vmatmul.mubr.f32.gmra.mrb[30].mxu1 %v3915_v58  ;;  %v3929_v1 = vmax.f32 %v759_v59, 0.0 }
 0x13b   : > { %3024 = vmatprep.mubr.f32.mxu1 %v3842_v14  ;;  %v3932_v2 = vmax.f32 %v754_v61, 0.0  ;;  %v2801_v3 = vpop.f32.mrb[34].mxu0 }
 0x13c   : > { %v769_v4 = vadd.f32 %v2801_v3, %v3772_v0  ;;  %v763_v5 = vpop.f32.mrb[35].mxu0 }
 0x13d   : > { %v764_v7 = vadd.f32 %v3772_v0, %v763_v5  ;;  %2900 = vmatprep.mubr.f32.mxu0 %v3932_v2 }
 0x13e   : > { %3025 = vmatmul.mubr.f32.vlgmr.msra.gmra.mrb[0].mxu1 %v3844_v16  ;;  %v3944_v10 = vmax.f32 %v769_v4, 0.0  ;;  %2901 = vmatmul.mubr.f32.gmra.mrb[80].mxu0 %v3929_v1  ;;  %v1849_v16 = vld [vmem:[%s4244_s3 + $0x1b0] sm:$0xff] }
 0x13f   : > { %3027 = vmatprep.mubr.f32.mxu1 %v3853_v20  ;;  %v3948_v11 = vmax.f32 %v764_v7, 0.0  ;;  %v2804_v13 = vpop.f32.mrb[36].mxu0  ;;  %3279 = vmatpush3.bf16.msra.mxu1 %v3839_v12  ;;  %v3288_v25 = vpack.c.bf16 %v1850_v19, %v1849_v16 }
 0x140   : > { %v779_v14 = vadd.f32 %v2804_v13, %v3772_v0  ;;  %v773_v15 = vpop.f32.mrb[37].mxu0  ;;  %3281 = vmatprep.subr.bf16.mxu1 %v3280_v6 }
 0x141   : > { %v774_v18 = vadd.f32 %v3772_v0, %v773_v15  ;;  %2903 = vmatprep.mubr.f32.mxu0 %v3948_v11 }
 0x142   : > { %3028 = vmatmul.mubr.f32.gmra.mrb[2].mxu1 %v3855_v22  ;;  %v3961_v12 = vmax.f32 %v779_v14, 0.0  ;;  %2904 = vmatmul.mubr.f32.gmra.mrb[82].mxu0 %v3944_v10  ;;  %v1851_v22 = vld [vmem:[%s4244_s3 + $0x1c0] sm:$0xff] }
 0x143   : > { %3030 = vmatprep.mubr.f32.mxu1 %v3863_v26  ;;  %v3965_v20 = vmax.f32 %v774_v18, 0.0  ;;  %v2807_v21 = vpop.f32.mrb[38].mxu0  ;;  %3283 = vmatpush3.bf16.msra.mxu1 %v3280_v6  ;;  %v1852_v26 = vld [vmem:[%s4244_s3 + $0x1c8] sm:$0xff] }
 0x144   : > { %v789_v23 = vadd.f32 %v2807_v21, %v3772_v0  ;;  %v783_v24 = vpop.f32.mrb[39].mxu0  ;;  %3285 = vmatprep.subr.bf16.mxu1 %v3284_v17  ;;  %v3292_v35 = vpack.c.bf16 %v1852_v26, %v1851_v22 }
 0x145   : > { %v784_v27 = vadd.f32 %v3772_v0, %v783_v24  ;;  %2906 = vmatprep.mubr.f32.mxu0 %v3965_v20 }
 0x146   : > { %3031 = vmatmul.mubr.f32.gmra.mrb[4].mxu1 %v3865_v28  ;;  %v3977_v29 = vmax.f32 %v789_v23, 0.0  ;;  %2907 = vmatmul.mubr.f32.gmra.mrb[84].mxu0 %v3961_v12  ;;  %v1854_v28 = vld [vmem:[%s4244_s3 + $0x1d8] sm:$0xff] }
 0x147   : > { %3033 = vmatprep.mubr.f32.mxu1 %v3873_v32  ;;  %v3981_v30 = vmax.f32 %v784_v27, 0.0  ;;  %v2810_v31 = vpop.f32.mrb[40].mxu0  ;;  %3287 = vmatpush3.bf16.msra.mxu1 %v3284_v17  ;;  %v3296_v39 = vpack.c.bf16 %v1854_v28, %v1853_v36 }
 0x148   : > { %v793_v33 = vpop.f32.mrb[41].mxu0  ;;  %3289 = vmatprep.subr.bf16.mxu1 %v3288_v25  ;;  %v799_v6 = vadd.f32 %v2810_v31, %v3772_v0 }
 0x149   : > { %2909 = vmatprep.mubr.f32.mxu0 %v3981_v30  ;;  %v794_v62 = vadd.f32 %v3772_v0, %v793_v33 }
 0x14a   : > { %3034 = vmatmul.mubr.f32.gmra.mrb[6].mxu1 %v3875_v34  ;;  %2910 = vmatmul.mubr.f32.gmra.mrb[86].mxu0 %v3977_v29  ;;  %v913_v9 = vmax.f32 %v799_v6, 0.0  ;;  %v3456_v6 = vmov 0  }
 0x14b   : > { %3036 = vmatprep.mubr.f32.mxu1 %v3883_v38  ;;  %v2813_v32 = vpop.f32.mrb[42].mxu0  ;;  %3291 = vmatpush3.bf16.msra.mxu1 %v3288_v25  ;;  %v912_v4 = vmax.f32 %v794_v62, 0.0 }
 0x14c   : > { %v803_v37 = vpop.f32.mrb[43].mxu0  ;;  %3293 = vmatprep.subr.bf16.mxu1 %v3292_v35  ;;  %v809_v13 = vadd.f32 %v2813_v32, %v3772_v0  ;;  %3446 = vset.pattern.permute.xlu0 %v3456_v6 }
 0x14d   : > { %v804_v5 = vadd.f32 %v3772_v0, %v803_v37  ;;  %3447 = vset.pattern.permute.xlu1 %v3456_v6 }
 0x14e   : > { %3037 = vmatmul.mubr.f32.gmra.mrb[8].mxu1 %v3885_v40  ;;  %v915_v17 = vmax.f32 %v809_v13, 0.0 }
 0x14f   : > { %3039 = vmatprep.mubr.f32.mxu1 %v3893_v44  ;;  %v2816_v34 = vpop.f32.mrb[44].mxu0  ;;  %3295 = vmatpush3.bf16.msra.mxu1 %v3292_v35  ;;  %v914_v7 = vmax.f32 %v804_v5, 0.0  ;;  %v2195_v5 = vld [vmem:[%s4247_s6 + $0x10] sm:$0xff] }
 0x150   : > { %v813_v43 = vpop.f32.mrb[45].mxu0  ;;  %3297 = vmatprep.subr.bf16.mxu1 %v3296_v39  ;;  %v819_v18 = vadd.f32 %v2816_v34, %v3772_v0  ;;  %2208 = vperm.xlu1 %3447, %v2195_v5  }
 0x151   : > { %v814_v8 = vadd.f32 %v3772_v0, %v813_v43 }
 0x152   : > { %3040 = vmatmul.mubr.f32.gmra.mrb[10].mxu1 %v3895_v46  ;;  %v917_v19 = vmax.f32 %v819_v18, 0.0 }
 0x153   : > { %3042 = vmatprep.mubr.f32.mxu1 %v3903_v50  ;;  %v2819_v49 = vpop.f32.mrb[46].mxu0  ;;  %3299 = vmatpush3.bf16.msra.mxu1 %v3296_v39  ;;  %v916_v14 = vmax.f32 %v814_v8, 0.0 }
 0x154   : > { %v823_v51 = vpop.f32.mrb[47].mxu0  ;;  %3301 = vmatprep.subr.bf16.mxu1 %v3300_v45  ;;  %v829_v21 = vadd.f32 %v2819_v49, %v3772_v0 }
 0x155   : > { %v824_v15 = vadd.f32 %v3772_v0, %v823_v51 }
 0x156   : > { %3043 = vmatmul.mubr.f32.gmra.mrb[12].mxu1 %v3905_v52  ;;  %v919_v23 = vmax.f32 %v829_v21, 0.0 }
 0x157   : > { %3045 = vmatprep.mubr.f32.mxu1 %v3913_v56  ;;  %3303 = vmatpush3.bf16.msra.mxu1 %v3300_v45  ;;  %v4011_v54 = vpop.f32.mrb[48].mxu0  ;;  %v918_v16 = vmax.f32 %v824_v15, 0.0 }
 0x158   : > { %3305 = vmatprep.subr.bf16.mxu1 %v3304_v53  ;;  %v833_v55 = vpop.f32.mrb[49].mxu0 }
 0x15a   : > { %3046 = vmatmul.mubr.f32.gmra.mrb[14].mxu1 %v3915_v58 }
 0x15b   : > { %3048 = vmatprep.mubr.f32.mxu1 %v3932_v2  ;;  %3307 = vmatpush3.bf16.msra.mxu1 %v3304_v53  ;;  %v4015_v57 = vpop.f32.mrb[50].mxu0 }
 0x15c   : > { %v843_v59 = vpop.f32.mrb[51].mxu0 }
 0x15e   : > { %3049 = vmatmul.mubr.f32.gmra.mrb[16].mxu1 %v3929_v1 }
 0x15f   : > { %3051 = vmatprep.mubr.f32.mxu1 %v3948_v11  ;;  %v4019_v60 = vpop.f32.mrb[52].mxu0 }
 0x160   : > { %v853_v61 = vpop.f32.mrb[53].mxu0 }
 0x162   : > { %3052 = vmatmul.mubr.f32.gmra.mrb[18].mxu1 %v3944_v10 }
 0x163   : > { %3054 = vmatprep.mubr.f32.mxu1 %v3965_v20  ;;  %v4024_v63 = vpop.f32.mrb[54].mxu0 }
 0x164   : > { %v4026_v3 = vpop.f32.mrb[55].mxu0  ;;  %v869_v24 = vadd.f32 %v4024_v63, %v3772_v0 }
 0x166   : > { %3055 = vmatmul.mubr.f32.gmra.mrb[20].mxu1 %v3961_v12  ;;  %v927_v25 = vmax.f32 %v869_v24, 0.0 }
 0x167   : > { %3057 = vmatprep.mubr.f32.mxu1 %v3981_v30 }
 0x16a   : > { %3058 = vmatmul.mubr.f32.gmra.mrb[22].mxu1 %v3977_v29 }
 0x16b   : > { %3060 = vmatprep.mubr.f32.mxu1 %v912_v4 }
 0x16e   : > { %3061 = vmatmul.mubr.f32.gmra.mrb[24].mxu1 %v913_v9 }
 0x16f   : > { %3063 = vmatprep.mubr.f32.mxu1 %v914_v7 }
 0x172   : > { %3064 = vmatmul.mubr.f32.gmra.mrb[26].mxu1 %v915_v17 }
 0x173   : > { %3066 = vmatprep.mubr.f32.mxu1 %v916_v14 }
 0x176   : > { %3067 = vmatmul.mubr.f32.gmra.mrb[28].mxu1 %v917_v19 }
 0x177   : > { %3069 = vmatprep.mubr.f32.mxu1 %v918_v16 }
 0x17a   : > { %3070 = vmatmul.mubr.f32.gmra.mrb[30].mxu1 %v919_v23 }
 0x17b   : > { %3104 = vmatprep.mubr.f32.mxu1 %v3883_v38  ;;  %v834_v38 = vadd.f32 %v3772_v0, %v833_v55 }
 0x17e   : > { %3105 = vmatmul.mubr.f32.vlgmr.msra.gmra.mrb[0].mxu1 %v3885_v40  ;;  %v920_v40 = vmax.f32 %v834_v38, 0.0 }
 0x17f   : > { %3107 = vmatprep.mubr.f32.mxu1 %v3893_v44  ;;  %v844_v44 = vadd.f32 %v3772_v0, %v843_v59 }
 0x182   : > { %3108 = vmatmul.mubr.f32.gmra.mrb[2].mxu1 %v3895_v46  ;;  %v839_v46 = vadd.f32 %v4011_v54, %v3772_v0 }
 0x183   : > { %3110 = vmatprep.mubr.f32.mxu1 %v3903_v50  ;;  %v922_v50 = vmax.f32 %v844_v44, 0.0 }
 0x186   : > { %3111 = vmatmul.mubr.f32.gmra.mrb[4].mxu1 %v3905_v52  ;;  %v854_v52 = vadd.f32 %v3772_v0, %v853_v61 }
 0x187   : > { %3113 = vmatprep.mubr.f32.mxu1 %v3913_v56  ;;  %v921_v56 = vmax.f32 %v839_v46, 0.0 }
 0x18a   : > { %3114 = vmatmul.mubr.f32.gmra.mrb[6].mxu1 %v3915_v58  ;;  %v849_v58 = vadd.f32 %v4015_v57, %v3772_v0 }
 0x18b   : > { %3116 = vmatprep.mubr.f32.mxu1 %v3932_v2  ;;  %v864_v2 = vadd.f32 %v3772_v0, %v4026_v3 }
 0x18e   : > { %3117 = vmatmul.mubr.f32.gmra.mrb[8].mxu1 %v3929_v1  ;;  %v924_v1 = vmax.f32 %v854_v52, 0.0 }
 0x18f   : > { %3119 = vmatprep.mubr.f32.mxu1 %v3948_v11  ;;  %v859_v11 = vadd.f32 %v4019_v60, %v3772_v0  ;;  %v2188_v60 = vld [vmem:[%s4246_s5 + $0x8] sm:$0xff] }
 0x190   : > { %2275 = vmatprep.mubr.f32.mxu0 %v2188_v60 }
 0x192   : > { %3120 = vmatmul.mubr.f32.gmra.mrb[10].mxu1 %v3944_v10  ;;  %v923_v10 = vmax.f32 %v849_v58, 0.0 }
 0x193   : > { %3122 = vmatprep.mubr.f32.mxu1 %v3965_v20  ;;  %v925_v20 = vmax.f32 %v859_v11, 0.0 }
 0x196   : > { %3123 = vmatmul.mubr.f32.gmra.mrb[12].mxu1 %v3961_v12  ;;  %v926_v12 = vmax.f32 %v864_v2, 0.0 }
 0x197   : > { %3125 = vmatprep.mubr.f32.mxu1 %v3981_v30 }
 0x19a   : > { %3126 = vmatmul.mubr.f32.gmra.mrb[14].mxu1 %v3977_v29 }
 0x19b   : > { %3128 = vmatprep.mubr.f32.mxu1 %v912_v4  ;;  %v2193_v4 = vld [vmem:[%s4247_s6] sm:$0xff] }
 0x19c   : > { %2198 = vperm.xlu0 %3446, %v2193_v4  }
 0x19e   : > { %3129 = vmatmul.mubr.f32.gmra.mrb[16].mxu1 %v913_v9  ;;  %v4134_v9 = vld [vmem:[%s4245_s4] ss:$0 sm:$0xff] }
 0x19f   : > { %3131 = vmatprep.mubr.f32.mxu1 %v914_v7  ;;  %v2194_v7 = vld [vmem:[%s4247_s6 + $0x8] sm:$0xff] }
 0x1a0   : > { %2203 = vperm.xlu0 %3446, %v2194_v7  }
 0x1a2   : > { %3132 = vmatmul.mubr.f32.gmra.mrb[18].mxu1 %v915_v17 }
 0x1a3   : > { %3134 = vmatprep.mubr.f32.mxu1 %v916_v14 }
 0x1a6   : > { %3135 = vmatmul.mubr.f32.gmra.mrb[20].mxu1 %v917_v19 }
 0x1a7   : > { %3137 = vmatprep.mubr.f32.mxu1 %v918_v16 }
 0x1aa   : > { %3138 = vmatmul.mubr.f32.gmra.mrb[22].mxu1 %v919_v23 }
 0x1ab   : > { %3140 = vmatprep.mubr.f32.mxu1 %v920_v40 }
 0x1ae   : > { %3141 = vmatmul.mubr.f32.gmra.mrb[24].mxu1 %v921_v56 }
 0x1af   : > { %3143 = vmatprep.mubr.f32.mxu1 %v922_v50 }
 0x1b2   : > { %3144 = vmatmul.mubr.f32.gmra.mrb[26].mxu1 %v923_v10 }
 0x1b3   : > { %3146 = vmatprep.mubr.f32.mxu1 %v924_v1 }
 0x1b6   : > { %3147 = vmatmul.mubr.f32.gmra.mrb[28].mxu1 %v925_v20 }
 0x1b7   : > { %3149 = vmatprep.mubr.f32.mxu1 %v926_v12 }
 0x1ba   : > { %3150 = vmatmul.mubr.f32.gmra.mrb[30].mxu1 %v927_v25 }
 0x1e1   : > { %v2866_v27 = vpop.f32.mrb[56].mxu0 }
 0x1e2   : > { %v1122_v22 = vpop.f32.mrb[57].mxu0 }
 0x1e5   : > { %v2869_v26 = vpop.f32.mrb[58].mxu0 }
 0x1e6   : > { %v1132_v29 = vpop.f32.mrb[59].mxu0 }
 0x1e9   : > { %v2872_v30 = vpop.f32.mrb[60].mxu0 }
 0x1ea   : > { %v1142_v31 = vpop.f32.mrb[61].mxu0 }
 0x1ed   : > { %v4067_v33 = vpop.f32.mrb[62].mxu0 }
 0x1ee   : > { %v4069_v35 = vpop.f32.mrb[63].mxu0 }
 0x1f1   : > { %v4071_v36 = vpop.f32.mrb[64].mxu0 }
 0x1f2   : > { %v4073_v28 = vpop.f32.mrb[65].mxu0 }
 0x1f5   : > { %v4075_v32 = vpop.f32.mrb[66].mxu0 }
 0x1f6   : > { %v4077_v0 = vpop.f32.mrb[67].mxu0 }
 0x1f9   : > { %v4079_v37 = vpop.f32.mrb[68].mxu0 }
 0x1fa   : > { %v4081_v39 = vpop.f32.mrb[69].mxu0 }
 0x1fd   : > { %v4083_v41 = vpop.f32.mrb[70].mxu0 }
 0x1fe   : > { %v4085_v42 = vpop.f32.mrb[71].mxu0 }
 0x201   : > { %v4087_v34 = vpop.f32.mrb[72].mxu0 }
 0x202   : > { %v4089_v43 = vpop.f32.mrb[73].mxu0 }
 0x205   : > { %v4091_v45 = vpop.f32.mrb[74].mxu0 }
 0x206   : > { %v4093_v47 = vpop.f32.mrb[75].mxu0 }
 0x209   : > { %v4095_v48 = vpop.f32.mrb[76].mxu0 }
 0x20a   : > { %v4097_v49 = vpop.f32.mrb[77].mxu0 }
 0x20d   : > { %v4099_v51 = vpop.f32.mrb[78].mxu0 }
 0x20e   : > { %v4101_v53 = vpop.f32.mrb[79].mxu0 }
 0x211   : > { %v4103_v54 = vpop.f32.mrb[80].mxu0 }
 0x212   : > { %v4105_v55 = vpop.f32.mrb[81].mxu0 }
 0x215   : > { %v4107_v57 = vpop.f32.mrb[82].mxu0 }
 0x216   : > { %v4109_v59 = vpop.f32.mrb[83].mxu0 }
 0x219   : > { %v4114_v61 = vpop.f32.mrb[84].mxu0 }
 0x21a   : > { %v4116_v62 = vpop.f32.mrb[85].mxu0 }
 0x21d   : > { %v4118_v63 = vpop.f32.mrb[86].mxu0 }
 0x21e   : > { %v4120_v3 = vpop.f32.mrb[87].mxu0 }
 0x251   : > { %v3106_v8 = vpop.f32.mrb[0].mxu1 }
 0x252   : > { %v3340_v13 = vadd.f32 %v3106_v8, %v2866_v27  ;;  %v1925_v14 = vpop.f32.mrb[1].mxu1 }
 0x253   : > { %v3341_v15 = vadd.f32 %v1925_v14, %v1122_v22 }
 0x254   : > { %v2124_v17 = vadd.f32 %v3340_v13, %v4134_v9 }
 0x255   : > { %v2123_v18 = vadd.f32 %v3341_v15, %v4134_v9  ;;  %v3109_v16 = vpop.f32.mrb[2].mxu1 }
 0x256   : > { %v2156_v19 = vmax.f32 %v2124_v17, 0.0  ;;  %v3342_v21 = vadd.f32 %v3109_v16, %v2869_v26  ;;  %v1935_v23 = vpop.f32.mrb[3].mxu1 }
 0x257   : > { %v2155_v38 = vmax.f32 %v2123_v18, 0.0  ;;  %v3343_v40 = vadd.f32 %v1935_v23, %v1132_v29 }
 0x258   : > { %v2126_v44 = vadd.f32 %v3342_v21, %v4134_v9 }
 0x259   : > { %v4139_v46 = vpack.c.bf16 %v2156_v19, %v2155_v38  ;;  %v2125_v50 = vadd.f32 %v3343_v40, %v4134_v9  ;;  %v3112_v52 = vpop.f32.mrb[4].mxu1 }
 0x25a   : > { %v2158_v56 = vmax.f32 %v2126_v44, 0.0  ;;  %v3344_v58 = vadd.f32 %v3112_v52, %v2872_v30  ;;  %v1945_v1 = vpop.f32.mrb[5].mxu1 }
 0x25b   : > { %v2157_v2 = vmax.f32 %v2125_v50, 0.0  ;;  %v3345_v10 = vadd.f32 %v1945_v1, %v1142_v31 }
 0x25c   : > { %v2128_v11 = vadd.f32 %v3344_v58, %v4134_v9 }
 0x25d   : > { %v4143_v12 = vpack.c.bf16 %v2158_v56, %v2157_v2  ;;  %v2127_v20 = vadd.f32 %v3345_v10, %v4134_v9  ;;  %v3115_v24 = vpop.f32.mrb[6].mxu1 }
 0x25e   : > { %v2160_v25 = vmax.f32 %v2128_v11, 0.0  ;;  %v3346_v27 = vadd.f32 %v3115_v24, %v4067_v33  ;;  %v1955_v22 = vpop.f32.mrb[7].mxu1 }
 0x25f   : > { %v2159_v26 = vmax.f32 %v2127_v20, 0.0  ;;  %v3347_v29 = vadd.f32 %v1955_v22, %v4069_v35 }
 0x260   : > { %v2130_v60 = vadd.f32 %v3346_v27, %v4134_v9 }
 0x261   : > { %v4149_v30 = vpack.c.bf16 %v2160_v25, %v2159_v26  ;;  %v2129_v31 = vadd.f32 %v3347_v29, %v4134_v9  ;;  %v3118_v4 = vpop.f32.mrb[8].mxu1 }
 0x262   : > { %v2162_v5 = vmax.f32 %v2130_v60, 0.0  ;;  %v3348_v6 = vadd.f32 %v3118_v4, %v4071_v36  ;;  %v1965_v7 = vpop.f32.mrb[9].mxu1 }
 0x263   : > { %v2161_v8 = vmax.f32 %v2129_v31, 0.0  ;;  %v3349_v13 = vadd.f32 %v1965_v7, %v4073_v28 }
 0x264   : > { %v2132_v33 = vadd.f32 %v3348_v6, %v4134_v9 }
 0x265   : > { %v4155_v14 = vpack.c.bf16 %v2162_v5, %v2161_v8  ;;  %v2131_v35 = vadd.f32 %v3349_v13, %v4134_v9  ;;  %v3121_v15 = vpop.f32.mrb[10].mxu1 }
 0x266   : > { %v2164_v17 = vmax.f32 %v2132_v33, 0.0  ;;  %v3350_v18 = vadd.f32 %v3121_v15, %v4075_v32  ;;  %v1975_v16 = vpop.f32.mrb[11].mxu1 }
 0x267   : > { %v2163_v19 = vmax.f32 %v2131_v35, 0.0  ;;  %v3351_v21 = vadd.f32 %v1975_v16, %v4077_v0 }
 0x268   : > { %v2134_v36 = vadd.f32 %v3350_v18, %v4134_v9 }
 0x269   : > { %v4161_v23 = vpack.c.bf16 %v2164_v17, %v2163_v19  ;;  %v2133_v28 = vadd.f32 %v3351_v21, %v4134_v9  ;;  %v3124_v38 = vpop.f32.mrb[12].mxu1 }
 0x26a   : > { %v2166_v40 = vmax.f32 %v2134_v36, 0.0  ;;  %v3352_v44 = vadd.f32 %v3124_v38, %v4079_v37  ;;  %v1985_v50 = vpop.f32.mrb[13].mxu1 }
 0x26b   : > { %v2165_v52 = vmax.f32 %v2133_v28, 0.0  ;;  %v3353_v56 = vadd.f32 %v1985_v50, %v4081_v39 }
 0x26c   : > { %v2136_v32 = vadd.f32 %v3352_v44, %v4134_v9 }
 0x26d   : > { %v4167_v58 = vpack.c.bf16 %v2166_v40, %v2165_v52  ;;  %v2135_v0 = vadd.f32 %v3353_v56, %v4134_v9  ;;  %v3127_v1 = vpop.f32.mrb[14].mxu1 }
 0x26e   : > { %v2168_v2 = vmax.f32 %v2136_v32, 0.0  ;;  %v3354_v10 = vadd.f32 %v3127_v1, %v4083_v41  ;;  %v1995_v11 = vpop.f32.mrb[15].mxu1 }
 0x26f   : > { %v2167_v20 = vmax.f32 %v2135_v0, 0.0  ;;  %v3355_v24 = vadd.f32 %v1995_v11, %v4085_v42 }
 0x270   : > { %v2138_v37 = vadd.f32 %v3354_v10, %v4134_v9 }
 0x271   : > { %v4173_v25 = vpack.c.bf16 %v2168_v2, %v2167_v20  ;;  %v2137_v39 = vadd.f32 %v3355_v24, %v4134_v9  ;;  %v3130_v27 = vpop.f32.mrb[16].mxu1 }
 0x272   : > { %v2170_v22 = vmax.f32 %v2138_v37, 0.0  ;;  %v3356_v26 = vadd.f32 %v3130_v27, %v4087_v34  ;;  %v2005_v29 = vpop.f32.mrb[17].mxu1 }
 0x273   : > { %v2169_v60 = vmax.f32 %v2137_v39, 0.0  ;;  %v3357_v31 = vadd.f32 %v2005_v29, %v4089_v43 }
 0x274   : > { %v2140_v41 = vadd.f32 %v3356_v26, %v4134_v9 }
 0x275   : > { %v4179_v4 = vpack.c.bf16 %v2170_v22, %v2169_v60  ;;  %v2139_v42 = vadd.f32 %v3357_v31, %v4134_v9  ;;  %v3133_v5 = vpop.f32.mrb[18].mxu1 }
 0x276   : > { %v2172_v6 = vmax.f32 %v2140_v41, 0.0  ;;  %v3358_v7 = vadd.f32 %v3133_v5, %v4091_v45  ;;  %v2015_v8 = vpop.f32.mrb[19].mxu1 }
 0x277   : > { %v2171_v13 = vmax.f32 %v2139_v42, 0.0  ;;  %v3359_v33 = vadd.f32 %v2015_v8, %v4093_v47 }
 0x278   : > { %v2142_v34 = vadd.f32 %v3358_v7, %v4134_v9 }
 0x279   : > { %v2141_v35 = vadd.f32 %v3359_v33, %v4134_v9  ;;  %v3136_v15 = vpop.f32.mrb[20].mxu1  ;;  %v3308_v43 = vpack.c.bf16 %v2172_v6, %v2171_v13 }
 0x27a   : > { %v2174_v17 = vmax.f32 %v2142_v34, 0.0  ;;  %v3360_v18 = vadd.f32 %v3136_v15, %v4095_v48  ;;  %v2025_v16 = vpop.f32.mrb[21].mxu1 }
 0x27b   : > { %v2173_v19 = vmax.f32 %v2141_v35, 0.0  ;;  %v3361_v21 = vadd.f32 %v2025_v16, %v4097_v49  ;;  %3309 = vmatprep.subr.bf16.mxu0 %v3308_v43  ;;  %v2199_v35 = vpop.permute.xlu0 %2198 }
 0x27c   : > { %v2144_v45 = vadd.f32 %v3360_v18, %v4134_v9  ;;  %3311 = vmatpush3.bf16.msra.mxu0 %v4139_v46 }
 0x27d   : > { %v2143_v47 = vadd.f32 %v3361_v21, %v4134_v9  ;;  %v3139_v36 = vpop.f32.mrb[22].mxu1  ;;  %v3312_v28 = vpack.c.bf16 %v2174_v17, %v2173_v19 }
 0x27e   : > { %v2176_v38 = vmax.f32 %v2144_v45, 0.0  ;;  %v3362_v40 = vadd.f32 %v3139_v36, %v4099_v51  ;;  %v2035_v44 = vpop.f32.mrb[23].mxu1 }
 0x27f   : > { %v2175_v50 = vmax.f32 %v2143_v47, 0.0  ;;  %v3363_v48 = vadd.f32 %v2035_v44, %v4101_v53  ;;  %3313 = vmatprep.subr.bf16.mxu0 %v3312_v28  ;;  %v2204_v21 = vpop.permute.xlu0 %2203 }
 0x280   : > { %v2146_v52 = vadd.f32 %v3362_v40, %v4134_v9  ;;  %3315 = vmatpush3.bf16.msra.mxu0 %v4143_v12 }
 0x281   : > { %v2145_v49 = vadd.f32 %v3363_v48, %v4134_v9  ;;  %v3142_v56 = vpop.f32.mrb[24].mxu1  ;;  %v3316_v46 = vpack.c.bf16 %v2176_v38, %v2175_v50  ;;  %v2209_v38 = vpop.permute.xlu1 %2208 }
 0x282   : > { %v2178_v32 = vmax.f32 %v2146_v52, 0.0  ;;  %v3364_v0 = vadd.f32 %v3142_v56, %v4103_v54  ;;  %v2045_v1 = vpop.f32.mrb[25].mxu1 }
 0x283   : > { %v2177_v2 = vmax.f32 %v2145_v49, 0.0  ;;  %v3365_v51 = vadd.f32 %v2045_v1, %v4105_v55  ;;  %3317 = vmatprep.subr.bf16.mxu0 %v3316_v46 }
 0x284   : > { %v2148_v10 = vadd.f32 %v3364_v0, %v4134_v9  ;;  %3319 = vmatpush3.bf16.msra.mxu0 %v4149_v30 }
 0x285   : > { %v2147_v53 = vadd.f32 %v3365_v51, %v4134_v9  ;;  %v3145_v11 = vpop.f32.mrb[26].mxu1  ;;  %v3320_v12 = vpack.c.bf16 %v2178_v32, %v2177_v2 }
 0x286   : > { %v2180_v20 = vmax.f32 %v2148_v10, 0.0  ;;  %v3366_v24 = vadd.f32 %v3145_v11, %v4107_v57  ;;  %v2055_v37 = vpop.f32.mrb[27].mxu1 }
 0x287   : > { %v2179_v39 = vmax.f32 %v2147_v53, 0.0  ;;  %v3367_v54 = vadd.f32 %v2055_v37, %v4109_v59  ;;  %3321 = vmatprep.subr.bf16.mxu0 %v3320_v12 }
 0x288   : > { %v2150_v27 = vadd.f32 %v3366_v24, %v4134_v9  ;;  %3323 = vmatpush3.bf16.msra.mxu0 %v4155_v14 }
 0x289   : > { %v2149_v55 = vadd.f32 %v3367_v54, %v4134_v9  ;;  %v3148_v22 = vpop.f32.mrb[28].mxu1  ;;  %v3324_v30 = vpack.c.bf16 %v2180_v20, %v2179_v39 }
 0x28a   : > { %v2182_v26 = vmax.f32 %v2150_v27, 0.0  ;;  %v3368_v29 = vadd.f32 %v3148_v22, %v4114_v61  ;;  %v2065_v60 = vpop.f32.mrb[29].mxu1 }
 0x28b   : > { %v2181_v31 = vmax.f32 %v2149_v55, 0.0  ;;  %v3369_v57 = vadd.f32 %v2065_v60, %v4116_v62  ;;  %3325 = vmatprep.subr.bf16.mxu0 %v3324_v30 }
 0x28c   : > { %v2152_v41 = vadd.f32 %v3368_v29, %v4134_v9  ;;  %3327 = vmatpush3.bf16.msra.mxu0 %v4161_v23 }
 0x28d   : > { %v2151_v59 = vadd.f32 %v3369_v57, %v4134_v9  ;;  %v3151_v42 = vpop.f32.mrb[30].mxu1  ;;  %v3328_v14 = vpack.c.bf16 %v2182_v26, %v2181_v31 }
 0x28e   : > { %v2184_v5 = vmax.f32 %v2152_v41, 0.0  ;;  %v3370_v6 = vadd.f32 %v3151_v42, %v4118_v63  ;;  %v2075_v7 = vpop.f32.mrb[31].mxu1 }
 0x28f   : > { %v2183_v8 = vmax.f32 %v2151_v59, 0.0  ;;  %v3371_v61 = vadd.f32 %v2075_v7, %v4120_v3  ;;  %3329 = vmatprep.subr.bf16.mxu0 %v3328_v14  ;;  %v2187_v3 = vld [vmem:[%s4246_s5] sm:$0xff] }
 0x290   : > { %v2154_v13 = vadd.f32 %v3370_v6, %v4134_v9  ;;  %3331 = vmatpush3.bf16.msra.mxu0 %v4167_v58  ;;  %v2189_v58 = vld [vmem:[%s4246_s5 + $0x10] sm:$0xff] }
 0x291   : > { %v2153_v62 = vadd.f32 %v3371_v61, %v4134_v9  ;;  %v3332_v33 = vpack.c.bf16 %v2184_v5, %v2183_v8  ;;  %v2190_v9 = vld [vmem:[%s4246_s5 + $0x18] sm:$0xff] }
 0x292   : > { %v2186_v23 = vmax.f32 %v2154_v13, 0.0 }
 0x293   : > { %v2185_v34 = vmax.f32 %v2153_v62, 0.0  ;;  %3333 = vmatprep.subr.bf16.mxu0 %v3332_v33 }
 0x294   : > { %3335 = vmatpush3.bf16.msra.mxu0 %v4173_v25  ;;  %v2192_v25 = vld [vmem:[%s4246_s5 + $0x28] sm:$0xff] }
 0x295   : > { %v3336_v63 = vpack.c.bf16 %v2186_v23, %v2185_v34 }
 0x297   : > { %3337 = vmatprep.subr.bf16.mxu0 %v3336_v63 }
 0x298   : > { %3339 = vmatpush3.bf16.msra.mxu0 %v4179_v4  ;;  %v2191_v4 = vld [vmem:[%s4246_s5 + $0x20] sm:$0xff] }
 0x29b   : > { %2276 = vmatmul.mubr.f32.vlgmr.msra.gmra.mrb[88].mxu0 %v2187_v3 }
 0x29c   : > { %2280 = vmatprep.mubr.f32.mxu0 %v2190_v9 }
 0x29f   : > { %2281 = vmatmul.mubr.f32.gmra.mrb[90].mxu0 %v2189_v58 }
 0x2a0   : > { %2285 = vmatprep.mubr.f32.mxu0 %v2192_v25 }
 0x2a3   : > { %2286 = vmatmul.mubr.f32.gmra.mrb[92].mxu0 %v2191_v4 }
 0x36e   : > { %v2711_v15 = vpop.f32.mrb[88].mxu0 }
 0x36f   : > { %v2712_v43 = vpop.f32.mrb[89].mxu0 }
 0x370   : > { %v2713_v17 = vadd.f32 %v2712_v43, %v2711_v15 }
 0x372   : > { %v2278_v18 = vadd.f32 %v2713_v17, %v2199_v35  ;;  %v2714_v16 = vpop.f32.mrb[90].mxu0 }
 0x373   : > { %v2715_v19 = vpop.f32.mrb[91].mxu0 }
 0x374   : > { %2292 = vst.msk [vmem:[%s280_s27] sm:$0xff] %vm2291_vm1, %v2278_v18  ;;  %v2716_v45 = vadd.f32 %v2715_v19, %v2714_v16 }
 0x376   : > { %v2283_v47 = vadd.f32 %v2716_v45, %v2204_v21  ;;  %v2717_v36 = vpop.f32.mrb[92].mxu0 }
 0x377   : > { %v2718_v28 = vpop.f32.mrb[93].mxu0 }
 0x378   : > { %2293 = vst.msk [vmem:[%s280_s27 + $0x8] sm:$0xff] %vm2291_vm1, %v2283_v47  ;;  %v2719_v40 = vadd.f32 %v2718_v28, %v2717_v36 }
 0x37a   : > { %v2288_v44 = vadd.f32 %v2719_v40, %v2209_v38 }
 0x37c   : > { %2294 = vst.msk [vmem:[%s280_s27 + $0x10] sm:$0xff] %vm2291_vm1, %v2288_v44 }
 0x37d PF: > { %s17_s24 = sadd.s32 1, %s3454_s24  }
 0x37e   : > { %p14_p5 = scmp.ge.s32.totalorder %s17_s24, 4  }
 0x380   :  { %16 = sbr.rel (!%p14_p5) target bundleno = 1 (0x1), region = 78 }

</bundles_post_ra>
